<compile_context>
chip_gen: v6e
topology: v6e:2x2x1
jax: 0.10.0
libtpu: 0.0.40
codegen_flags: <defaults>
</compile_context>

<pallas_src>
import math
from functools import partial

import jax
import jax.numpy as jnp
from jax.experimental import pallas as pl
from jax.experimental.pallas import tpu as pltpu

OCTUPLE_MAX_IDXS = (255, 127, 128, 255, 127, 31, 253, 48)
OUT_DIMS = tuple(d + 4 for d in OCTUPLE_MAX_IDXS)  # (259, 131, 132, 259, 131, 35, 257, 52)


def _round_up(v, m):
    return ((v + m - 1) // m) * m


def _num_tensorcores():
    """v7x has 2 TensorCores per chip; v5e/v6e have 1. Default to 1 if unknown."""
    try:
        kind = jax.devices()[0].device_kind.lower()
    except Exception:
        return 1
    return 2 if "v7" in kind else 1


def _fused_linear_kernel(x_ref, w_ref, b_ref, o_ref, *, tile_n, n_pad):
    # o_tile = cast_bf16(x_tile) @ w_tile + bias_slice   (f32 MXU accumulate)
    x_bf = x_ref[...].astype(jnp.bfloat16)          # cast on VPU; data already in VMEM
    acc = jnp.dot(x_bf, w_ref[...], preferred_element_type=jnp.float32)
    if tile_n == n_pad:
        bias = b_ref[...]                           # (1, n_pad), fully resident
    else:
        j = pl.program_id(1)
        off = pl.multiple_of(j * tile_n, tile_n)
        bias = b_ref[:, pl.ds(off, tile_n)]         # 128-aligned lane slice, no extra DMA
    o_ref[...] = (acc + bias).astype(o_ref.dtype)


def fused_linear(x2d, w, b, *, tile_m, tile_n, out_dtype=jnp.float32):
    """x2d: [M, K] f32 (M % tile_m == 0), w: [K, n_pad] bf16, b: [1, n_pad] f32."""
    M, K = x2d.shape
    Kw, n_pad = w.shape
    assert K == Kw
    assert M % tile_m == 0 and n_pad % tile_n == 0

    grid = (M // tile_m, n_pad // tile_n)

    out_itemsize = jnp.dtype(out_dtype).itemsize
    flops = 2 * M * K * n_pad
    bytes_accessed = (
        M * K * x2d.dtype.itemsize        # x streamed once (constant across the N axis)
        + K * n_pad * w.dtype.itemsize    # W streamed exactly once (resident across M tiles)
        + n_pad * b.dtype.itemsize        # bias resident
        + M * n_pad * out_itemsize        # output
    )

    kernel = partial(_fused_linear_kernel, tile_n=tile_n, n_pad=n_pad)

    return pl.pallas_call(
        kernel,
        out_shape=jax.ShapeDtypeStruct((M, n_pad), out_dtype),
        grid_spec=pltpu.PrefetchScalarGridSpec(
            num_scalar_prefetch=0,
            grid=grid,
            in_specs=[
                pl.BlockSpec((tile_m, K), lambda i, j: (i, 0)),   # x M-tile (held across N steps)
                pl.BlockSpec((K, tile_n), lambda i, j: (0, j)),   # W: constant index when gn==1
                pl.BlockSpec((1, n_pad), lambda i, j: (0, 0)),    # bias fully resident
            ],
            out_specs=pl.BlockSpec((tile_m, tile_n), lambda i, j: (i, j)),
        ),
        compiler_params=pltpu.CompilerParams(
            # Independent output tiles (K is not a grid axis); on v7x the M axis (or the
            # N split on the tiny-M path) can be sharded across the two TensorCores.
            dimension_semantics=("parallel", "parallel"),
        ),
        cost_estimate=pl.CostEstimate(
            flops=flops, transcendentals=0, bytes_accessed=bytes_accessed
        ),
    )(x2d, w, b)


class OctupleClassifierPallas:
    """8 parallel Linear(d_model -> d+4) heads, fused into one Pallas matmul."""

    def __init__(self, d_model: int = 512, key=None, out_dtype=jnp.float32):
        self.d_model = d_model
        self.out_dims = OUT_DIMS
        self.out_dtype = out_dtype
        self._num_cores = _num_tensorcores()
        if key is None:
            key = jax.random.PRNGKey(0)

        # Deterministic init mirroring nn.Linear: U(-1/sqrt(in), 1/sqrt(in)).
        bound = 1.0 / math.sqrt(d_model)
        n_total = sum(self.out_dims)
        self.n_total = n_total
        self.n_pad = _round_up(n_total, 128)          # 1256 -> 1280

        ws, bs = [], []
        for i, n in enumerate(self.out_dims):
            kw, kb = jax.random.split(jax.random.fold_in(key, i))
            ws.append(jax.random.uniform(kw, (d_model, n), jnp.float32, -bound, bound))
            bs.append(jax.random.uniform(kb, (n,), jnp.float32, -bound, bound))

        w_cat = jnp.concatenate(ws, axis=1)                       # [d_model, n_total]
        b_cat = jnp.concatenate(bs, axis=0)                       # [n_total]
        pad = self.n_pad - n_total
        # bf16 weights: kernel is weight-streaming bound at small M; f32 bias.
        self.w = jnp.pad(w_cat, ((0, 0), (0, pad))).astype(jnp.bfloat16)   # [d_model, n_pad]
        self.b = jnp.pad(b_cat, ((0, pad),))[None, :].astype(jnp.float32)  # [1, n_pad]

    def _choose_tiles(self, M):
        if M <= 1024:
            # Whole problem fits in VMEM: one M tile.
            tile_m = _round_up(max(M, 8), 8)
            if self._num_cores >= 2 and self.n_pad % 640 == 0:
                # v7x: 2-way N split so each TensorCore streams half of W.
                tile_n = 640
            else:
                # v5e/v6e (1 TC): single 1280-wide pass, no extra grid step.
                tile_n = self.n_pad
        else:
            # Resident-W path: W is held across all M tiles (streamed once), so only
            # x and the output move per tile.  Pick the largest tile_m whose padding
            # waste stays under ~12%.
            tile_n = self.n_pad
            tile_m = 128
            for cand in (1024, 512, 256):
                if (_round_up(M, cand) - M) <= 0.12 * M:
                    tile_m = cand
                    break
        return tile_m, tile_n

    def __call__(self, x):
        # x: [batch, seq, d_model]  ->  list of 8 tensors [batch, seq, out_dim_i]
        batch, seq, d = x.shape
        assert d == self.d_model
        M = batch * seq

        tile_m, tile_n = self._choose_tiles(M)
        m_pad = _round_up(M, tile_m)

        x2d = x.reshape(M, d)                          # stays f32; cast to bf16 in-kernel
        if m_pad != M:
            x2d = jnp.pad(x2d, ((0, m_pad - M), (0, 0)))

        fused = fused_linear(
            x2d, self.w, self.b, tile_m=tile_m, tile_n=tile_n, out_dtype=self.out_dtype
        )  # [m_pad, n_pad]
        if m_pad != M:
            fused = fused[:M]

        # TODO(synk): head offsets are not 128-aligned, so these slices are XLA copies
        # (~2x the kernel's own HBM traffic at large M); downstream code that can consume
        # the fused [M, n_pad] tensor directly should do so instead.
        outs = []
        off = 0
        for n in self.out_dims:
            outs.append(fused[:, off:off + n].reshape(batch, seq, n))
            off += n
        return outs


if __name__ == "__main__":
    key = jax.random.PRNGKey(0)
    d_model = 512
    batch, seq = 2, 8

    model = OctupleClassifierPallas(d_model=d_model, key=jax.random.fold_in(key, 123))
    x = jax.random.normal(jax.random.fold_in(key, 7), (batch, seq, d_model), jnp.float32)

    outs = model(x)
    outs = jax.block_until_ready(outs)

    # Pure-JAX reference on the same bf16-rounded operands the kernel sees.
    x_bf = x.astype(jnp.bfloat16).astype(jnp.float32)
    w_f = model.w.astype(jnp.float32)
    fused_ref = jnp.einsum("bsd,dn->bsn", x_bf, w_f,
                           preferred_element_type=jnp.float32) + model.b[0]

    off = 0
    for o, n in zip(outs, model.out_dims):
        r = fused_ref[..., off:off + n]
        off += n
        assert o.shape == (batch, seq, n), (o.shape, n)
        assert jnp.allclose(o.astype(jnp.float32), r, atol=2e-2, rtol=2e-2), \
            f"mismatch for head width {n}"

    print("KERNEL_OK")
</pallas_src>

<mosaic_0001>
module attributes {stable_mosaic.version = 11 : i64} {
  func.func @_fused_linear_kernel(%arg0: i32, %arg1: i32, %arg2: memref<16x512xf32, #tpu.memory_space<vmem>>, %arg3: memref<512x1280xbf16, #tpu.memory_space<vmem>>, %arg4: memref<1x1280xf32, #tpu.memory_space<vmem>>, %arg5: memref<16x1280xf32, #tpu.memory_space<vmem>>) attributes {dimension_semantics = [#tpu.dimension_semantics<parallel>, #tpu.dimension_semantics<parallel>], iteration_bounds = array<i64: 1, 1>, scalar_prefetch = 0 : i64, scratch_operands = 0 : i64, tpu.core_type = #tpu.core_type<tc>, window_params = [{transform_indices = @transform_0, window_bounds = array<i64: 16, 512>}, {transform_indices = @transform_1, window_bounds = array<i64: 512, 1280>}, {pipeline_mode = #tpu.pipeline_mode<synchronous>, transform_indices = @transform_2, window_bounds = array<i64: 1, 1280>}, {transform_indices = @transform_3, window_bounds = array<i64: 16, 1280>}]} {
    %c0 = arith.constant 0 : index
    %c0_0 = arith.constant 0 : index
    %0 = vector.load %arg2[%c0, %c0_0] : memref<16x512xf32, #tpu.memory_space<vmem>>, vector<16x512xf32>
    %1 = arith.truncf %0 : vector<16x512xf32> to vector<16x512xbf16>
    %c0_1 = arith.constant 0 : index
    %c0_2 = arith.constant 0 : index
    %2 = vector.load %arg3[%c0_1, %c0_2] : memref<512x1280xbf16, #tpu.memory_space<vmem>>, vector<512x1280xbf16>
    %cst = arith.constant dense<0.000000e+00> : vector<16x1280xf32>
    %3 = tpu.matmul %1, %2, %cst {dimension_numbers = #tpu.dot_dimension_numbers<[1], [0], [0], [1], [0, 0, 1, 1], [], []>} : vector<16x512xbf16>, vector<512x1280xbf16>, vector<16x1280xf32> -> vector<16x1280xf32>
    %c0_3 = arith.constant 0 : index
    %c0_4 = arith.constant 0 : index
    %4 = vector.load %arg4[%c0_3, %c0_4] : memref<1x1280xf32, #tpu.memory_space<vmem>>, vector<1x1280xf32>
    %5 = vector.broadcast %4 : vector<1x1280xf32> to vector<16x1280xf32>
    %6 = arith.addf %3, %5 : vector<16x1280xf32>
    %c0_5 = arith.constant 0 : index
    %c0_6 = arith.constant 0 : index
    %7 = vector.load %arg5[%c0_5, %c0_6] : memref<16x1280xf32, #tpu.memory_space<vmem>>, vector<16x1280xf32>
    tpu.vector_store %arg5[%c0_5, %c0_6], %6 {strides = array<i32>} : memref<16x1280xf32, #tpu.memory_space<vmem>>, vector<16x1280xf32>,
    return
  }
  func.func @transform_0(%arg0: i32, %arg1: i32) -> (i32, i32) {
    %c0_i32 = arith.constant 0 : i32
    %c0_i32_0 = arith.constant 0 : i32
    return %arg0, %c0_i32 : i32, i32
  }
  func.func @transform_1(%arg0: i32, %arg1: i32) -> (i32, i32) {
    %c0_i32 = arith.constant 0 : i32
    %c0_i32_0 = arith.constant 0 : i32
    return %c0_i32, %arg1 : i32, i32
  }
  func.func @transform_2(%arg0: i32, %arg1: i32) -> (i32, i32) {
    %c0_i32 = arith.constant 0 : i32
    %c0_i32_0 = arith.constant 0 : i32
    %c0_i32_1 = arith.constant 0 : i32
    return %c0_i32, %c0_i32_0 : i32, i32
  }
  func.func @transform_3(%arg0: i32, %arg1: i32) -> (i32, i32) {
    %c0_i32 = arith.constant 0 : i32
    return %arg0, %arg1 : i32, i32
  }
}

</mosaic_0001>

<bundles_post_ra>
// kernel: tpu_custom_call.1
= control target key start
LH: loop header
LB: loop body
LE: loop exit
PB: predicated region body
PF: predicated region fallthrough
CT: control target
= control target key end

     0   :  { %8 = vsyncpa [#allocation3], 0  ;;  %s3502_s0 = inlined_call_operand.hbm [shape: f32[16,512], index: 0, kind: input, shape index: {}]   ;;  %s3503_s1 = inlined_call_operand.hbm [shape: bf16[512,1280], index: 1, kind: input, shape index: {}]   ;;  %s3504_s2 = inlined_call_operand.hbm [shape: f32[1,1280], index: 2, kind: input, shape index: {}]   ;;  %s3505_s3 = inlined_call_operand.hbm [shape: f32[16,1280], index: 3, kind: output, shape index: {}]  }
   0x1   :  { %9 = vsyncpa [#allocation6], 0 }
   0x2   :  { %10 = vsyncpa [#allocation4], 0  ;;  %s3404_s12 = smov [#allocation5]  }
   0x3   :  { %s28_s13 = sshll.u32 %s3404_s12, 4  ;;  %s29_s13 = int_to_ptr.vmem [resolvable:$true] %s28_s13 }
   0x4   :  { %s3326_s14 = scalar_lea.vmem %s29_s13, 40960  ;;  %p3331_p1 = scmp.lt.s32.totalorder %s29_s13, %s29_s13 }
   0x5   :  { %p3327_p0 = scmp.ne.s32.totalorder %s29_s13, %s3326_s14  ;;  %p3332_p2 = scmp.lt.s32.totalorder %s3326_s14, %s3326_s14 }
   0x7   :  { %p3333_p3 = por %p3332_p2, %p3331_p1 }
   0x9   :  { %p3334_p4 = pnand %p3333_p3, %p3327_p0 }
   0xb   :  { %3337 = shalt.err (!%p3334_p4)
}
   0xc   :  { %s3405_s15 = smov 640   ;;  %s3406_s16 = smov 40  }
   0xd   :  { %34 = dma.hbm_to_vmem [thread:$0]  %s3503_s1, 40960, %s29_s13, [#allocation6], %s3405_s15, %s3405_s15, %s3406_s16  }
   0xe   :  { %s3407_s19 = smov [#allocation2]  }
   0xf   :  { %s16_s20 = sshll.u32 %s3407_s19, 4  ;;  %s17_s20 = int_to_ptr.vmem [resolvable:$true] %s16_s20 }
  0x10   :  { %s3346_s21 = scalar_lea.vmem %s17_s20, 1024  ;;  %p3351_p6 = scmp.lt.s32.totalorder %s17_s20, %s17_s20 }
  0x11   :  { %p3347_p5 = scmp.ne.s32.totalorder %s17_s20, %s3346_s21  ;;  %p3352_p7 = scmp.lt.s32.totalorder %s3346_s21, %s3346_s21 }
  0x13   :  { %p3353_p8 = por %p3352_p7, %p3351_p6 }
  0x15   :  { %p3354_p9 = pnand %p3353_p8, %p3347_p5 }
  0x17   :  { %3357 = shalt.err (!%p3354_p9)
}
  0x18   :  { %s3408_s22 = smov 512   ;;  %s3409_s23 = smov 32  }
  0x19   :  { %22 = dma.hbm_to_vmem [thread:$0]  %s3502_s0, 1024, %s17_s20, [#allocation3], %s3408_s22, %s3408_s22, %s3409_s23  }
  0x1a   :  { %s3410_s26 = smov [#allocation7]  }
  0x1b   :  { %s41_s27 = sshll.u32 %s3410_s26, 4  ;;  %s42_s27 = int_to_ptr.vmem [resolvable:$true] %s41_s27 }
  0x1c   :  { %s3366_s1 = scalar_lea.vmem %s42_s27, 160  ;;  %p3371_p11 = scmp.lt.s32.totalorder %s42_s27, %s42_s27 }
  0x1d   :  { %p3367_p10 = scmp.ne.s32.totalorder %s42_s27, %s3366_s1  ;;  %p3372_p12 = scmp.lt.s32.totalorder %s3366_s1, %s3366_s1 }
  0x1f   :  { %p3373_p13 = por %p3372_p12, %p3371_p11 }
  0x21   :  { %p3374_p0 = pnand %p3373_p13, %p3367_p10 }
  0x23   :  { %3377 = shalt.err (!%p3374_p0)
}
  0x24   :  { %44 = dma.hbm_to_vmem [thread:$0]  %s3504_s2, 160, %s42_s27, [#allocation6]  }
  0x25   :  { %3398 = dma.done.wait [#allocation3], 1024  }
  0x26   :  { %3399 = vsyncadd [#allocation3], 4294966272 }
  0x27   :  { %3400 = dma.done.wait [#allocation6], 41120  }
  0x28   :  { %3401 = vsyncadd [#allocation6], 4294926176  ;;  %v2838_v0 = vld [vmem:[#allocation5 + $0x234] ss:$40 sps:$4 sm:$0xff]   ;;  %v2842_v2 = vld [vmem:[#allocation5 + $0x230] ss:$40 sps:$4 sm:$0xff]  }
  0x29   :  { %v2840_v1 = vld [vmem:[#allocation5 + $0x734] ss:$40 sps:$4 sm:$0xff]   ;;  %2040 = vmatprep.subr.bf16.mxu0 %v2838_v0  ;;  %v2843_v3 = vld [vmem:[#allocation5 + $0x730] ss:$40 sps:$4 sm:$0xff]   ;;  %v2844_v4 = vld [vmem:[#allocation5 + $0x1e4] ss:$40 sps:$4 sm:$0xff]  }
  0x2a   :  { %2083 = vmatprep.subr.bf16.mxu1 %v2840_v1  ;;  %2041 = vmatpush1.bf16.msra.mxu0 %v2842_v2  ;;  %v2846_v5 = vld [vmem:[#allocation5 + $0x6e4] ss:$40 sps:$4 sm:$0xff]   ;;  %v2848_v6 = vld [vmem:[#allocation5 + $0x1e0] ss:$40 sps:$4 sm:$0xff]   ;;  %v2850_v8 = vld [vmem:[#allocation5 + $0x194] ss:$40 sps:$4 sm:$0xff]  }
  0x2b   :  { %2084 = vmatpush1.bf16.msra.mxu1 %v2843_v3  ;;  %2042 = vmatprep.subr.bf16.mxu0 %v2844_v4  ;;  %v2849_v7 = vld [vmem:[#allocation5 + $0x6e0] ss:$40 sps:$4 sm:$0xff]   ;;  %v2852_v9 = vld [vmem:[#allocation5 + $0x694] ss:$40 sps:$4 sm:$0xff]   ;;  %v2854_v10 = vld [vmem:[#allocation5 + $0x190] ss:$40 sps:$4 sm:$0xff]  }
  0x2c   :  { %2085 = vmatprep.subr.bf16.mxu1 %v2846_v5  ;;  %v2855_v11 = vld [vmem:[#allocation5 + $0x690] ss:$40 sps:$4 sm:$0xff]   ;;  %v2856_v12 = vld [vmem:[#allocation5 + $0x144] ss:$40 sps:$4 sm:$0xff]   ;;  %v2860_v14 = vld [vmem:[#allocation5 + $0x140] ss:$40 sps:$4 sm:$0xff]  }
  0x2d   :  { %v2858_v13 = vld [vmem:[#allocation5 + $0x644] ss:$40 sps:$4 sm:$0xff]   ;;  %v2861_v15 = vld [vmem:[#allocation5 + $0x640] ss:$40 sps:$4 sm:$0xff]   ;;  %v2862_v16 = vld [vmem:[#allocation5 + $0xf4] ss:$40 sps:$4 sm:$0xff]  }
  0x2e   :  { %2043 = vmatpush1.bf16.msra.mxu0 %v2848_v6  ;;  %v2864_v17 = vld [vmem:[#allocation5 + $0x5f4] ss:$40 sps:$4 sm:$0xff]   ;;  %v2866_v18 = vld [vmem:[#allocation5 + $0xf0] ss:$40 sps:$4 sm:$0xff]   ;;  %v2868_v20 = vld [vmem:[#allocation5 + $0xa4] ss:$40 sps:$4 sm:$0xff]  }
  0x2f   :  { %2086 = vmatpush1.bf16.msra.mxu1 %v2849_v7  ;;  %2044 = vmatprep.subr.bf16.mxu0 %v2850_v8  ;;  %v2867_v19 = vld [vmem:[#allocation5 + $0x5f0] ss:$40 sps:$4 sm:$0xff]   ;;  %v2870_v21 = vld [vmem:[#allocation5 + $0x5a4] ss:$40 sps:$4 sm:$0xff]   ;;  %v2872_v22 = vld [vmem:[#allocation5 + $0xa0] ss:$40 sps:$4 sm:$0xff]  }
  0x30   :  { %2087 = vmatprep.subr.bf16.mxu1 %v2852_v9  ;;  %v2873_v23 = vld [vmem:[#allocation5 + $0x5a0] ss:$40 sps:$4 sm:$0xff]   ;;  %v2874_v24 = vld [vmem:[#allocation5 + $0x54] ss:$40 sps:$4 sm:$0xff]   ;;  %v2878_v26 = vld [vmem:[#allocation5 + $0x50] ss:$40 sps:$4 sm:$0xff]  }
  0x31   :  { %v2876_v25 = vld [vmem:[#allocation5 + $0x554] ss:$40 sps:$4 sm:$0xff]   ;;  %v2879_v27 = vld [vmem:[#allocation5 + $0x550] ss:$40 sps:$4 sm:$0xff]   ;;  %v2880_v28 = vld [vmem:[#allocation5 + $0x4] ss:$40 sps:$4 sm:$0xff]  }
  0x32   :  { %2045 = vmatpush1.bf16.msra.mxu0 %v2854_v10  ;;  %v2882_v29 = vld [vmem:[#allocation5 + $0x504] ss:$40 sps:$4 sm:$0xff]   ;;  %v2884_v30 = vld [vmem:[#allocation5] ss:$40 sps:$4 sm:$0xff]   ;;  %v2886_v32 = vld [vmem:[#allocation5 + $0x4b4] ss:$40 sps:$4 sm:$0xff]  }
  0x33   :  { %2088 = vmatpush1.bf16.msra.mxu1 %v2855_v11  ;;  %2046 = vmatprep.subr.bf16.mxu0 %v2856_v12  ;;  %v2885_v31 = vld [vmem:[#allocation5 + $0x500] ss:$40 sps:$4 sm:$0xff]   ;;  %v2888_v33 = vld [vmem:[#allocation5 + $0x9b4] ss:$40 sps:$4 sm:$0xff]   ;;  %v2890_v34 = vld [vmem:[#allocation5 + $0x4b0] ss:$40 sps:$4 sm:$0xff]  }
  0x34   :  { %2089 = vmatprep.subr.bf16.mxu1 %v2858_v13  ;;  %v2891_v35 = vld [vmem:[#allocation5 + $0x9b0] ss:$40 sps:$4 sm:$0xff]   ;;  %v2892_v36 = vld [vmem:[#allocation5 + $0x464] ss:$40 sps:$4 sm:$0xff]   ;;  %v2896_v38 = vld [vmem:[#allocation5 + $0x460] ss:$40 sps:$4 sm:$0xff]  }
  0x35   :  { %v2894_v37 = vld [vmem:[#allocation5 + $0x964] ss:$40 sps:$4 sm:$0xff]   ;;  %v2897_v39 = vld [vmem:[#allocation5 + $0x960] ss:$40 sps:$4 sm:$0xff]   ;;  %v2898_v40 = vld [vmem:[#allocation5 + $0x414] ss:$40 sps:$4 sm:$0xff]  }
  0x36   :  { %2047 = vmatpush1.bf16.msra.mxu0 %v2860_v14  ;;  %v2900_v41 = vld [vmem:[#allocation5 + $0x914] ss:$40 sps:$4 sm:$0xff]   ;;  %v2902_v42 = vld [vmem:[#allocation5 + $0x410] ss:$40 sps:$4 sm:$0xff]   ;;  %v2904_v44 = vld [vmem:[#allocation5 + $0x3c4] ss:$40 sps:$4 sm:$0xff]  }
  0x37   :  { %2090 = vmatpush1.bf16.msra.mxu1 %v2861_v15  ;;  %2048 = vmatprep.subr.bf16.mxu0 %v2862_v16  ;;  %v2903_v43 = vld [vmem:[#allocation5 + $0x910] ss:$40 sps:$4 sm:$0xff]   ;;  %v2906_v45 = vld [vmem:[#allocation5 + $0x8c4] ss:$40 sps:$4 sm:$0xff]   ;;  %v2908_v50 = vld [vmem:[#allocation5 + $0x3c0] ss:$40 sps:$4 sm:$0xff]  }
  0x38   :  { %2091 = vmatprep.subr.bf16.mxu1 %v2864_v17  ;;  %v55_v46 = vld [vmem:[#allocation2 + $0x8] sm:$0xff]  ;;  %v57_v48 = vld [vmem:[#allocation2 + $0x18] sm:$0xff]  ;;  %v54_v6 = vld [vmem:[#allocation2] sm:$0xff]  ;;  %s3411_s0 = smov [#allocation8]  }
  0x39   :  { %v59_v47 = vld [vmem:[#allocation2 + $0x28] sm:$0xff]  ;;  %v61_v49 = vld [vmem:[#allocation2 + $0x38] sm:$0xff]  ;;  %v58_v7 = vld [vmem:[#allocation2 + $0x20] sm:$0xff]  ;;  %s2495_s2 = sshll.u32 %s3411_s0, 4  ;;  %s2496_s2 = int_to_ptr.vmem [resolvable:$true] %s2495_s2 }
  0x3a   :  { %2049 = vmatpush1.bf16.msra.mxu0 %v2866_v18  ;;  %v2909_v51 = vld [vmem:[#allocation5 + $0x8c0] ss:$40 sps:$4 sm:$0xff]   ;;  %v2910_v52 = vld [vmem:[#allocation5 + $0x374] ss:$40 sps:$4 sm:$0xff]   ;;  %v3443_v53 = vpack.c.bf16 %v59_v47, %v55_v46  ;;  %v3445_v54 = vpack.c.bf16 %v61_v49, %v57_v48  ;;  %v2914_v56 = vld [vmem:[#allocation5 + $0x370] ss:$40 sps:$4 sm:$0xff]   ;;  %v3449_v12 = vpack.c.bf16 %v58_v7, %v54_v6  ;;  %p3383_p2 = scmp.lt.s32.totalorder %s2496_s2, %s2496_s2 }
  0x3b   :  { %2092 = vmatpush1.bf16.msra.mxu1 %v2867_v19  ;;  %2050 = vmatprep.subr.bf16.mxu0 %v2868_v20  ;;  %v2912_v55 = vld [vmem:[#allocation5 + $0x874] ss:$40 sps:$4 sm:$0xff]   ;;  %v2915_v57 = vld [vmem:[#allocation5 + $0x870] ss:$40 sps:$4 sm:$0xff]   ;;  %v2916_v58 = vld [vmem:[#allocation5 + $0x324] ss:$40 sps:$4 sm:$0xff]  }
  0x3c   :  { %2093 = vmatprep.subr.bf16.mxu1 %v2870_v21  ;;  %2072 = vmatprep.mubr.bf16.mxu0 %v3443_v53  ;;  %v2918_v59 = vld [vmem:[#allocation5 + $0x824] ss:$40 sps:$4 sm:$0xff]   ;;  %v2920_v60 = vld [vmem:[#allocation5 + $0x320] ss:$40 sps:$4 sm:$0xff]   ;;  %v2922_v62 = vld [vmem:[#allocation5 + $0x2d4] ss:$40 sps:$4 sm:$0xff]  }
  0x3d   :  { %2115 = vmatprep.mubr.bf16.mxu1 %v3445_v54  ;;  %v2921_v61 = vld [vmem:[#allocation5 + $0x820] ss:$40 sps:$4 sm:$0xff]   ;;  %v2924_v63 = vld [vmem:[#allocation5 + $0x7d4] ss:$40 sps:$4 sm:$0xff]   ;;  %v2926_v0 = vld [vmem:[#allocation5 + $0x2d0] ss:$40 sps:$4 sm:$0xff]  }
  0x3e   :  { %2051 = vmatpush1.bf16.msra.mxu0 %v2872_v22  ;;  %v2927_v1 = vld [vmem:[#allocation5 + $0x7d0] ss:$40 sps:$4 sm:$0xff]   ;;  %v2928_v2 = vld [vmem:[#allocation5 + $0x284] ss:$40 sps:$4 sm:$0xff]   ;;  %v2932_v4 = vld [vmem:[#allocation5 + $0x280] ss:$40 sps:$4 sm:$0xff]  }
  0x3f   :  { %2094 = vmatpush1.bf16.msra.mxu1 %v2873_v23  ;;  %2052 = vmatprep.subr.bf16.mxu0 %v2874_v24  ;;  %v2930_v3 = vld [vmem:[#allocation5 + $0x784] ss:$40 sps:$4 sm:$0xff]   ;;  %v2933_v5 = vld [vmem:[#allocation5 + $0x780] ss:$40 sps:$4 sm:$0xff]   ;;  %v56_v8 = vld [vmem:[#allocation2 + $0x10] sm:$0xff]  ;;  %s3378_s30 = scalar_lea.vmem %s2496_s2, 2560 }
  0x40   :  { %2095 = vmatprep.subr.bf16.mxu1 %v2876_v25  ;;  %v60_v9 = vld [vmem:[#allocation2 + $0x30] sm:$0xff]  ;;  %v2936_v10 = vld [vmem:[#allocation5 + $0x23c] ss:$40 sps:$4 sm:$0xff]   ;;  %v2934_v14 = vld [vmem:[#allocation5 + $0x238] ss:$40 sps:$4 sm:$0xff]   ;;  %p3379_p1 = scmp.ne.s32.totalorder %s2496_s2, %s3378_s30  ;;  %p3384_p3 = scmp.lt.s32.totalorder %s3378_s30, %s3378_s30 }
  0x41   :  { %v2939_v11 = vld [vmem:[#allocation5 + $0x73c] ss:$40 sps:$4 sm:$0xff]   ;;  %v3451_v13 = vpack.c.bf16 %v60_v9, %v56_v8  ;;  %v2937_v15 = vld [vmem:[#allocation5 + $0x738] ss:$40 sps:$4 sm:$0xff]   ;;  %v2942_v16 = vld [vmem:[#allocation5 + $0x1ec] ss:$40 sps:$4 sm:$0xff]  }
  0x42   :  { %2053 = vmatpush1.bf16.msra.mxu0 %v2878_v26  ;;  %v2945_v17 = vld [vmem:[#allocation5 + $0x6ec] ss:$40 sps:$4 sm:$0xff]   ;;  %v2940_v18 = vld [vmem:[#allocation5 + $0x1e8] ss:$40 sps:$4 sm:$0xff]   ;;  %v2948_v20 = vld [vmem:[#allocation5 + $0x19c] ss:$40 sps:$4 sm:$0xff]   ;;  %p3385_p4 = por %p3384_p3, %p3383_p2 }
  0x43   :  { %2096 = vmatpush1.bf16.msra.mxu1 %v2879_v27  ;;  %2054 = vmatprep.subr.bf16.mxu0 %v2880_v28  ;;  %v2943_v19 = vld [vmem:[#allocation5 + $0x6e8] ss:$40 sps:$4 sm:$0xff]   ;;  %v2951_v21 = vld [vmem:[#allocation5 + $0x69c] ss:$40 sps:$4 sm:$0xff]   ;;  %v2946_v22 = vld [vmem:[#allocation5 + $0x198] ss:$40 sps:$4 sm:$0xff]  }
  0x44   :  { %2097 = vmatprep.subr.bf16.mxu1 %v2882_v29  ;;  %v2949_v23 = vld [vmem:[#allocation5 + $0x698] ss:$40 sps:$4 sm:$0xff]   ;;  %v2954_v24 = vld [vmem:[#allocation5 + $0x14c] ss:$40 sps:$4 sm:$0xff]   ;;  %v2952_v26 = vld [vmem:[#allocation5 + $0x148] ss:$40 sps:$4 sm:$0xff]   ;;  %p3386_p5 = pnand %p3385_p4, %p3379_p1 }
  0x45   :  { %v2957_v25 = vld [vmem:[#allocation5 + $0x64c] ss:$40 sps:$4 sm:$0xff]   ;;  %v2955_v27 = vld [vmem:[#allocation5 + $0x648] ss:$40 sps:$4 sm:$0xff]   ;;  %v2960_v28 = vld [vmem:[#allocation5 + $0xfc] ss:$40 sps:$4 sm:$0xff]  }
  0x46   :  { %2055 = vmatpush1.bf16.msra.mxu0 %v2884_v30  ;;  %v2963_v29 = vld [vmem:[#allocation5 + $0x5fc] ss:$40 sps:$4 sm:$0xff]   ;;  %v2958_v30 = vld [vmem:[#allocation5 + $0xf8] ss:$40 sps:$4 sm:$0xff]   ;;  %v2990_v48 = vld [vmem:[#allocation5 + $0x46c] ss:$40 sps:$4 sm:$0xff]  }
  0x47   :  { %2098 = vmatpush1.bf16.msra.mxu1 %v2885_v31  ;;  %2056 = vmatprep.subr.bf16.mxu0 %v2886_v32  ;;  %v2961_v31 = vld [vmem:[#allocation5 + $0x5f8] ss:$40 sps:$4 sm:$0xff]   ;;  %v2966_v32 = vld [vmem:[#allocation5 + $0xac] ss:$40 sps:$4 sm:$0xff]   ;;  %v3020_v6 = vld [vmem:[#allocation5 + $0x2dc] ss:$40 sps:$4 sm:$0xff]  }
  0x48   :  { %2099 = vmatprep.subr.bf16.mxu1 %v2888_v33  ;;  %v2969_v33 = vld [vmem:[#allocation5 + $0x5ac] ss:$40 sps:$4 sm:$0xff]   ;;  %v2982_v46 = vld [vmem:[#allocation5 + $0x4b8] ss:$40 sps:$4 sm:$0xff]   ;;  %v3023_v7 = vld [vmem:[#allocation5 + $0x7dc] ss:$40 sps:$4 sm:$0xff]  }
  0x49   :  { %v2985_v47 = vld [vmem:[#allocation5 + $0x9b8] ss:$40 sps:$4 sm:$0xff]   ;;  %v2993_v49 = vld [vmem:[#allocation5 + $0x96c] ss:$40 sps:$4 sm:$0xff]  }
  0x4a   :  { %2057 = vmatpush2.bf16.msra.mxu0 %v2890_v34  ;;  %v2964_v34 = vld [vmem:[#allocation5 + $0xa8] ss:$40 sps:$4 sm:$0xff]   ;;  %v3018_v8 = vld [vmem:[#allocation5 + $0x2d8] ss:$40 sps:$4 sm:$0xff]  }
  0x4b   :  { %2100 = vmatpush2.bf16.msra.mxu1 %v2891_v35  ;;  %2058 = vmatprep.subr.bf16.mxu0 %v2892_v36  ;;  %v2967_v35 = vld [vmem:[#allocation5 + $0x5a8] ss:$40 sps:$4 sm:$0xff]   ;;  %v2972_v36 = vld [vmem:[#allocation5 + $0x5c] ss:$40 sps:$4 sm:$0xff]   ;;  %v3021_v9 = vld [vmem:[#allocation5 + $0x7d8] ss:$40 sps:$4 sm:$0xff]  }
  0x4c   :  { %2101 = vmatprep.subr.bf16.mxu1 %v2894_v37  ;;  %v2975_v37 = vld [vmem:[#allocation5 + $0x55c] ss:$40 sps:$4 sm:$0xff]  }
  0x4e   :  { %2059 = vmatpush2.bf16.msra.mxu0 %v2896_v38  ;;  %v2970_v38 = vld [vmem:[#allocation5 + $0x58] ss:$40 sps:$4 sm:$0xff]  }
  0x4f   :  { %2102 = vmatpush2.bf16.msra.mxu1 %v2897_v39  ;;  %2060 = vmatprep.subr.bf16.mxu0 %v2898_v40  ;;  %v2973_v39 = vld [vmem:[#allocation5 + $0x558] ss:$40 sps:$4 sm:$0xff]   ;;  %v2978_v40 = vld [vmem:[#allocation5 + $0xc] ss:$40 sps:$4 sm:$0xff]  }
  0x50   :  { %2103 = vmatprep.subr.bf16.mxu1 %v2900_v41  ;;  %v2981_v41 = vld [vmem:[#allocation5 + $0x50c] ss:$40 sps:$4 sm:$0xff]  }
  0x52   :  { %2061 = vmatpush2.bf16.msra.mxu0 %v2902_v42  ;;  %v2976_v42 = vld [vmem:[#allocation5 + $0x8] ss:$40 sps:$4 sm:$0xff]  }
  0x53   :  { %2104 = vmatpush2.bf16.msra.mxu1 %v2903_v43  ;;  %2062 = vmatprep.subr.bf16.mxu0 %v2904_v44  ;;  %v2979_v43 = vld [vmem:[#allocation5 + $0x508] ss:$40 sps:$4 sm:$0xff]   ;;  %v2984_v44 = vld [vmem:[#allocation5 + $0x4bc] ss:$40 sps:$4 sm:$0xff]  }
  0x54   :  { %2105 = vmatprep.subr.bf16.mxu1 %v2906_v45  ;;  %v2987_v45 = vld [vmem:[#allocation5 + $0x9bc] ss:$40 sps:$4 sm:$0xff]  }
  0x56   :  { %2063 = vmatpush2.bf16.msra.mxu0 %v2908_v50  ;;  %v2988_v50 = vld [vmem:[#allocation5 + $0x468] ss:$40 sps:$4 sm:$0xff]  }
  0x57   :  { %2106 = vmatpush2.bf16.msra.mxu1 %v2909_v51  ;;  %2064 = vmatprep.subr.bf16.mxu0 %v2910_v52  ;;  %v2991_v51 = vld [vmem:[#allocation5 + $0x968] ss:$40 sps:$4 sm:$0xff]   ;;  %v2996_v52 = vld [vmem:[#allocation5 + $0x41c] ss:$40 sps:$4 sm:$0xff]  }
  0x58   :  { %2107 = vmatprep.subr.bf16.mxu1 %v2912_v55  ;;  %v2999_v55 = vld [vmem:[#allocation5 + $0x91c] ss:$40 sps:$4 sm:$0xff]  }
  0x5a   :  { %2065 = vmatpush2.bf16.msra.mxu0 %v2914_v56  ;;  %v2994_v56 = vld [vmem:[#allocation5 + $0x418] ss:$40 sps:$4 sm:$0xff]  }
  0x5b   :  { %2108 = vmatpush2.bf16.msra.mxu1 %v2915_v57  ;;  %2066 = vmatprep.subr.bf16.mxu0 %v2916_v58  ;;  %v2997_v57 = vld [vmem:[#allocation5 + $0x918] ss:$40 sps:$4 sm:$0xff]   ;;  %v3002_v58 = vld [vmem:[#allocation5 + $0x3cc] ss:$40 sps:$4 sm:$0xff]  }
  0x5c   :  { %2109 = vmatprep.subr.bf16.mxu1 %v2918_v59  ;;  %v3005_v59 = vld [vmem:[#allocation5 + $0x8cc] ss:$40 sps:$4 sm:$0xff]  }
  0x5e   :  { %2067 = vmatpush2.bf16.msra.mxu0 %v2920_v60  ;;  %v3000_v60 = vld [vmem:[#allocation5 + $0x3c8] ss:$40 sps:$4 sm:$0xff]  }
  0x5f   :  { %2110 = vmatpush2.bf16.msra.mxu1 %v2921_v61  ;;  %2068 = vmatprep.subr.bf16.mxu0 %v2922_v62  ;;  %v3003_v61 = vld [vmem:[#allocation5 + $0x8c8] ss:$40 sps:$4 sm:$0xff]   ;;  %v3008_v62 = vld [vmem:[#allocation5 + $0x37c] ss:$40 sps:$4 sm:$0xff]  }
  0x60   :  { %2111 = vmatprep.subr.bf16.mxu1 %v2924_v63  ;;  %v3011_v63 = vld [vmem:[#allocation5 + $0x87c] ss:$40 sps:$4 sm:$0xff]  }
  0x62   :  { %2069 = vmatpush2.bf16.msra.mxu0 %v2926_v0  ;;  %v3006_v0 = vld [vmem:[#allocation5 + $0x378] ss:$40 sps:$4 sm:$0xff]  }
  0x63   :  { %2112 = vmatpush2.bf16.msra.mxu1 %v2927_v1  ;;  %2070 = vmatprep.subr.bf16.mxu0 %v2928_v2  ;;  %v3009_v1 = vld [vmem:[#allocation5 + $0x878] ss:$40 sps:$4 sm:$0xff]   ;;  %v3014_v2 = vld [vmem:[#allocation5 + $0x32c] ss:$40 sps:$4 sm:$0xff]  }
  0x64   :  { %2113 = vmatprep.subr.bf16.mxu1 %v2930_v3  ;;  %v3017_v3 = vld [vmem:[#allocation5 + $0x82c] ss:$40 sps:$4 sm:$0xff]  }
  0x66   :  { %2071 = vmatpush2.bf16.msra.mxu0 %v2932_v4  ;;  %v3012_v4 = vld [vmem:[#allocation5 + $0x328] ss:$40 sps:$4 sm:$0xff]  }
  0x67   :  { %2114 = vmatpush2.bf16.msra.mxu1 %v2933_v5  ;;  %2126 = vmatprep.subr.bf16.mxu0 %v2936_v10  ;;  %v3015_v5 = vld [vmem:[#allocation5 + $0x828] ss:$40 sps:$4 sm:$0xff]   ;;  %v3026_v10 = vld [vmem:[#allocation5 + $0x28c] ss:$40 sps:$4 sm:$0xff]  }
  0x68   :  { %2169 = vmatprep.subr.bf16.mxu1 %v2939_v11  ;;  %v3029_v11 = vld [vmem:[#allocation5 + $0x78c] ss:$40 sps:$4 sm:$0xff]  }
  0x69   :  { %2073 = vmatmul.mubr.bf16.vlgmr.msra.gmra.mxu0 %v3449_v12 }
  0x6a   :  { %2116 = vmatmul.mubr.bf16.vlgmr.msra.gmra.mxu1 %v3451_v13  ;;  %2127 = vmatpush1.bf16.msra.mxu0 %v2934_v14  ;;  %v3024_v14 = vld [vmem:[#allocation5 + $0x288] ss:$40 sps:$4 sm:$0xff]  }
  0x6b   :  { %2170 = vmatpush1.bf16.msra.mxu1 %v2937_v15  ;;  %2128 = vmatprep.subr.bf16.mxu0 %v2942_v16  ;;  %v3027_v15 = vld [vmem:[#allocation5 + $0x788] ss:$40 sps:$4 sm:$0xff]   ;;  %v3032_v16 = vld [vmem:[#allocation5 + $0x244] ss:$40 sps:$4 sm:$0xff]  }
  0x6c   :  { %2171 = vmatprep.subr.bf16.mxu1 %v2945_v17  ;;  %2158 = vmatprep.mubr.bf16.mxu0 %v3443_v53  ;;  %v3035_v17 = vld [vmem:[#allocation5 + $0x744] ss:$40 sps:$4 sm:$0xff]  }
  0x6d   :  { %2201 = vmatprep.mubr.bf16.mxu1 %v3445_v54 }
  0x6e   :  { %2129 = vmatpush1.bf16.msra.mxu0 %v2940_v18  ;;  %v3030_v18 = vld [vmem:[#allocation5 + $0x240] ss:$40 sps:$4 sm:$0xff]  }
  0x6f   :  { %2172 = vmatpush1.bf16.msra.mxu1 %v2943_v19  ;;  %2130 = vmatprep.subr.bf16.mxu0 %v2948_v20  ;;  %v3033_v19 = vld [vmem:[#allocation5 + $0x740] ss:$40 sps:$4 sm:$0xff]   ;;  %v3038_v20 = vld [vmem:[#allocation5 + $0x1f4] ss:$40 sps:$4 sm:$0xff]  }
  0x70   :  { %2173 = vmatprep.subr.bf16.mxu1 %v2951_v21  ;;  %v3041_v21 = vld [vmem:[#allocation5 + $0x6f4] ss:$40 sps:$4 sm:$0xff]  }
  0x72   :  { %2131 = vmatpush1.bf16.msra.mxu0 %v2946_v22  ;;  %v3036_v22 = vld [vmem:[#allocation5 + $0x1f0] ss:$40 sps:$4 sm:$0xff]  }
  0x73   :  { %2174 = vmatpush1.bf16.msra.mxu1 %v2949_v23  ;;  %2132 = vmatprep.subr.bf16.mxu0 %v2954_v24  ;;  %v3039_v23 = vld [vmem:[#allocation5 + $0x6f0] ss:$40 sps:$4 sm:$0xff]   ;;  %v3044_v24 = vld [vmem:[#allocation5 + $0x1a4] ss:$40 sps:$4 sm:$0xff]  }
  0x74   :  { %2175 = vmatprep.subr.bf16.mxu1 %v2957_v25  ;;  %v3047_v25 = vld [vmem:[#allocation5 + $0x6a4] ss:$40 sps:$4 sm:$0xff]  }
  0x76   :  { %2133 = vmatpush1.bf16.msra.mxu0 %v2952_v26  ;;  %v3042_v26 = vld [vmem:[#allocation5 + $0x1a0] ss:$40 sps:$4 sm:$0xff]  }
  0x77   :  { %2176 = vmatpush1.bf16.msra.mxu1 %v2955_v27  ;;  %2134 = vmatprep.subr.bf16.mxu0 %v2960_v28  ;;  %v3045_v27 = vld [vmem:[#allocation5 + $0x6a0] ss:$40 sps:$4 sm:$0xff]   ;;  %v3050_v28 = vld [vmem:[#allocation5 + $0x154] ss:$40 sps:$4 sm:$0xff]  }
  0x78   :  { %2177 = vmatprep.subr.bf16.mxu1 %v2963_v29  ;;  %v3053_v29 = vld [vmem:[#allocation5 + $0x654] ss:$40 sps:$4 sm:$0xff]  }
  0x7a   :  { %2135 = vmatpush1.bf16.msra.mxu0 %v2958_v30  ;;  %v3048_v30 = vld [vmem:[#allocation5 + $0x150] ss:$40 sps:$4 sm:$0xff]  }
  0x7b   :  { %2178 = vmatpush1.bf16.msra.mxu1 %v2961_v31  ;;  %2136 = vmatprep.subr.bf16.mxu0 %v2966_v32  ;;  %v3051_v31 = vld [vmem:[#allocation5 + $0x650] ss:$40 sps:$4 sm:$0xff]   ;;  %v3056_v32 = vld [vmem:[#allocation5 + $0x104] ss:$40 sps:$4 sm:$0xff]  }
  0x7c   :  { %2179 = vmatprep.subr.bf16.mxu1 %v2969_v33  ;;  %v3059_v33 = vld [vmem:[#allocation5 + $0x604] ss:$40 sps:$4 sm:$0xff]  }
  0x7e   :  { %2137 = vmatpush1.bf16.msra.mxu0 %v2964_v34  ;;  %v3054_v34 = vld [vmem:[#allocation5 + $0x100] ss:$40 sps:$4 sm:$0xff]  }
  0x7f   :  { %2180 = vmatpush1.bf16.msra.mxu1 %v2967_v35  ;;  %2138 = vmatprep.subr.bf16.mxu0 %v2972_v36  ;;  %v3057_v35 = vld [vmem:[#allocation5 + $0x600] ss:$40 sps:$4 sm:$0xff]   ;;  %v3062_v36 = vld [vmem:[#allocation5 + $0xb4] ss:$40 sps:$4 sm:$0xff]  }
  0x80   :  { %2181 = vmatprep.subr.bf16.mxu1 %v2975_v37  ;;  %v3065_v37 = vld [vmem:[#allocation5 + $0x5b4] ss:$40 sps:$4 sm:$0xff]  }
  0x82   :  { %2139 = vmatpush1.bf16.msra.mxu0 %v2970_v38  ;;  %v3060_v38 = vld [vmem:[#allocation5 + $0xb0] ss:$40 sps:$4 sm:$0xff]  }
  0x83   :  { %2182 = vmatpush1.bf16.msra.mxu1 %v2973_v39  ;;  %2140 = vmatprep.subr.bf16.mxu0 %v2978_v40  ;;  %v3063_v39 = vld [vmem:[#allocation5 + $0x5b0] ss:$40 sps:$4 sm:$0xff]   ;;  %v3068_v40 = vld [vmem:[#allocation5 + $0x64] ss:$40 sps:$4 sm:$0xff]  }
  0x84   :  { %2183 = vmatprep.subr.bf16.mxu1 %v2981_v41  ;;  %v3071_v41 = vld [vmem:[#allocation5 + $0x564] ss:$40 sps:$4 sm:$0xff]  }
  0x86   :  { %2141 = vmatpush1.bf16.msra.mxu0 %v2976_v42  ;;  %v3066_v42 = vld [vmem:[#allocation5 + $0x60] ss:$40 sps:$4 sm:$0xff]  }
  0x87   :  { %2184 = vmatpush1.bf16.msra.mxu1 %v2979_v43  ;;  %2142 = vmatprep.subr.bf16.mxu0 %v2984_v44  ;;  %v3069_v43 = vld [vmem:[#allocation5 + $0x560] ss:$40 sps:$4 sm:$0xff]   ;;  %v3074_v44 = vld [vmem:[#allocation5 + $0x14] ss:$40 sps:$4 sm:$0xff]  }
  0x88   :  { %2185 = vmatprep.subr.bf16.mxu1 %v2987_v45  ;;  %v3077_v45 = vld [vmem:[#allocation5 + $0x514] ss:$40 sps:$4 sm:$0xff]  }
  0x8a   :  { %2143 = vmatpush2.bf16.msra.mxu0 %v2982_v46  ;;  %v3072_v46 = vld [vmem:[#allocation5 + $0x10] ss:$40 sps:$4 sm:$0xff]  }
  0x8b   :  { %2186 = vmatpush2.bf16.msra.mxu1 %v2985_v47  ;;  %2144 = vmatprep.subr.bf16.mxu0 %v2990_v48  ;;  %v3075_v47 = vld [vmem:[#allocation5 + $0x510] ss:$40 sps:$4 sm:$0xff]   ;;  %v3080_v48 = vld [vmem:[#allocation5 + $0x4c4] ss:$40 sps:$4 sm:$0xff]  }
  0x8c   :  { %2187 = vmatprep.subr.bf16.mxu1 %v2993_v49  ;;  %v3083_v49 = vld [vmem:[#allocation5 + $0x9c4] ss:$40 sps:$4 sm:$0xff]  }
  0x8e   :  { %2145 = vmatpush2.bf16.msra.mxu0 %v2988_v50  ;;  %v3078_v50 = vld [vmem:[#allocation5 + $0x4c0] ss:$40 sps:$4 sm:$0xff]  }
  0x8f   :  { %2188 = vmatpush2.bf16.msra.mxu1 %v2991_v51  ;;  %2146 = vmatprep.subr.bf16.mxu0 %v2996_v52  ;;  %v3081_v51 = vld [vmem:[#allocation5 + $0x9c0] ss:$40 sps:$4 sm:$0xff]   ;;  %v3086_v52 = vld [vmem:[#allocation5 + $0x474] ss:$40 sps:$4 sm:$0xff]  }
  0x90   :  { %2189 = vmatprep.subr.bf16.mxu1 %v2999_v55  ;;  %v3089_v55 = vld [vmem:[#allocation5 + $0x974] ss:$40 sps:$4 sm:$0xff]  }
  0x92   :  { %2147 = vmatpush2.bf16.msra.mxu0 %v2994_v56  ;;  %v3084_v56 = vld [vmem:[#allocation5 + $0x470] ss:$40 sps:$4 sm:$0xff]  }
  0x93   :  { %2190 = vmatpush2.bf16.msra.mxu1 %v2997_v57  ;;  %2148 = vmatprep.subr.bf16.mxu0 %v3002_v58  ;;  %v3087_v57 = vld [vmem:[#allocation5 + $0x970] ss:$40 sps:$4 sm:$0xff]   ;;  %v3092_v58 = vld [vmem:[#allocation5 + $0x424] ss:$40 sps:$4 sm:$0xff]  }
  0x94   :  { %2191 = vmatprep.subr.bf16.mxu1 %v3005_v59  ;;  %v3095_v59 = vld [vmem:[#allocation5 + $0x924] ss:$40 sps:$4 sm:$0xff]  }
  0x96   :  { %2149 = vmatpush2.bf16.msra.mxu0 %v3000_v60  ;;  %v3090_v60 = vld [vmem:[#allocation5 + $0x420] ss:$40 sps:$4 sm:$0xff]  }
  0x97   :  { %2192 = vmatpush2.bf16.msra.mxu1 %v3003_v61  ;;  %2150 = vmatprep.subr.bf16.mxu0 %v3008_v62  ;;  %v3093_v61 = vld [vmem:[#allocation5 + $0x920] ss:$40 sps:$4 sm:$0xff]   ;;  %v3098_v62 = vld [vmem:[#allocation5 + $0x3d4] ss:$40 sps:$4 sm:$0xff]  }
  0x98   :  { %2193 = vmatprep.subr.bf16.mxu1 %v3011_v63  ;;  %v3101_v63 = vld [vmem:[#allocation5 + $0x8d4] ss:$40 sps:$4 sm:$0xff]  }
  0x9a   :  { %2151 = vmatpush2.bf16.msra.mxu0 %v3006_v0  ;;  %v3096_v0 = vld [vmem:[#allocation5 + $0x3d0] ss:$40 sps:$4 sm:$0xff]  }
  0x9b   :  { %2194 = vmatpush2.bf16.msra.mxu1 %v3009_v1  ;;  %2152 = vmatprep.subr.bf16.mxu0 %v3014_v2  ;;  %v3099_v1 = vld [vmem:[#allocation5 + $0x8d0] ss:$40 sps:$4 sm:$0xff]   ;;  %v3104_v2 = vld [vmem:[#allocation5 + $0x384] ss:$40 sps:$4 sm:$0xff]  }
  0x9c   :  { %2195 = vmatprep.subr.bf16.mxu1 %v3017_v3  ;;  %v3107_v3 = vld [vmem:[#allocation5 + $0x884] ss:$40 sps:$4 sm:$0xff]  }
  0x9e   :  { %2153 = vmatpush2.bf16.msra.mxu0 %v3012_v4  ;;  %v3102_v4 = vld [vmem:[#allocation5 + $0x380] ss:$40 sps:$4 sm:$0xff]  }
  0x9f   :  { %2196 = vmatpush2.bf16.msra.mxu1 %v3015_v5  ;;  %2154 = vmatprep.subr.bf16.mxu0 %v3020_v6  ;;  %v3105_v5 = vld [vmem:[#allocation5 + $0x880] ss:$40 sps:$4 sm:$0xff]   ;;  %v3110_v6 = vld [vmem:[#allocation5 + $0x334] ss:$40 sps:$4 sm:$0xff]  }
  0xa0   :  { %2197 = vmatprep.subr.bf16.mxu1 %v3023_v7  ;;  %v3113_v7 = vld [vmem:[#allocation5 + $0x834] ss:$40 sps:$4 sm:$0xff]  }
  0xa2   :  { %2155 = vmatpush2.bf16.msra.mxu0 %v3018_v8  ;;  %v3108_v8 = vld [vmem:[#allocation5 + $0x330] ss:$40 sps:$4 sm:$0xff]  }
  0xa3   :  { %2198 = vmatpush2.bf16.msra.mxu1 %v3021_v9  ;;  %2156 = vmatprep.subr.bf16.mxu0 %v3026_v10  ;;  %v3111_v9 = vld [vmem:[#allocation5 + $0x830] ss:$40 sps:$4 sm:$0xff]   ;;  %v3116_v10 = vld [vmem:[#allocation5 + $0x2e4] ss:$40 sps:$4 sm:$0xff]  }
  0xa4   :  { %2199 = vmatprep.subr.bf16.mxu1 %v3029_v11  ;;  %v3119_v11 = vld [vmem:[#allocation5 + $0x7e4] ss:$40 sps:$4 sm:$0xff]  }
  0xa6   :  { %2157 = vmatpush2.bf16.msra.mxu0 %v3024_v14  ;;  %v3114_v14 = vld [vmem:[#allocation5 + $0x2e0] ss:$40 sps:$4 sm:$0xff]  }
  0xa7   :  { %2200 = vmatpush2.bf16.msra.mxu1 %v3027_v15  ;;  %2212 = vmatprep.subr.bf16.mxu0 %v3032_v16  ;;  %v3117_v15 = vld [vmem:[#allocation5 + $0x7e0] ss:$40 sps:$4 sm:$0xff]   ;;  %v3122_v16 = vld [vmem:[#allocation5 + $0x294] ss:$40 sps:$4 sm:$0xff]  }
  0xa8   :  { %2255 = vmatprep.subr.bf16.mxu1 %v3035_v17  ;;  %v3125_v17 = vld [vmem:[#allocation5 + $0x794] ss:$40 sps:$4 sm:$0xff]  }
  0xa9   :  { %2159 = vmatmul.mubr.bf16.vlgmr.msra.gmra.mxu0 %v3449_v12 }
  0xaa   :  { %2202 = vmatmul.mubr.bf16.vlgmr.msra.gmra.mxu1 %v3451_v13  ;;  %2213 = vmatpush1.bf16.msra.mxu0 %v3030_v18  ;;  %v3120_v18 = vld [vmem:[#allocation5 + $0x290] ss:$40 sps:$4 sm:$0xff]  }
  0xab   :  { %2256 = vmatpush1.bf16.msra.mxu1 %v3033_v19  ;;  %2214 = vmatprep.subr.bf16.mxu0 %v3038_v20  ;;  %v3123_v19 = vld [vmem:[#allocation5 + $0x790] ss:$40 sps:$4 sm:$0xff]   ;;  %v3128_v20 = vld [vmem:[#allocation5 + $0x24c] ss:$40 sps:$4 sm:$0xff]  }
  0xac   :  { %2257 = vmatprep.subr.bf16.mxu1 %v3041_v21  ;;  %2244 = vmatprep.mubr.bf16.mxu0 %v3443_v53  ;;  %v3131_v21 = vld [vmem:[#allocation5 + $0x74c] ss:$40 sps:$4 sm:$0xff]  }
  0xad   :  { %2287 = vmatprep.mubr.bf16.mxu1 %v3445_v54 }
  0xae   :  { %2215 = vmatpush1.bf16.msra.mxu0 %v3036_v22  ;;  %v3126_v22 = vld [vmem:[#allocation5 + $0x248] ss:$40 sps:$4 sm:$0xff]  }
  0xaf   :  { %2258 = vmatpush1.bf16.msra.mxu1 %v3039_v23  ;;  %2216 = vmatprep.subr.bf16.mxu0 %v3044_v24  ;;  %v3129_v23 = vld [vmem:[#allocation5 + $0x748] ss:$40 sps:$4 sm:$0xff]   ;;  %v3134_v24 = vld [vmem:[#allocation5 + $0x1fc] ss:$40 sps:$4 sm:$0xff]  }
  0xb0   :  { %2259 = vmatprep.subr.bf16.mxu1 %v3047_v25  ;;  %v3137_v25 = vld [vmem:[#allocation5 + $0x6fc] ss:$40 sps:$4 sm:$0xff]  }
  0xb2   :  { %2217 = vmatpush1.bf16.msra.mxu0 %v3042_v26  ;;  %v3132_v26 = vld [vmem:[#allocation5 + $0x1f8] ss:$40 sps:$4 sm:$0xff]  }
  0xb3   :  { %2260 = vmatpush1.bf16.msra.mxu1 %v3045_v27  ;;  %2218 = vmatprep.subr.bf16.mxu0 %v3050_v28  ;;  %v3135_v27 = vld [vmem:[#allocation5 + $0x6f8] ss:$40 sps:$4 sm:$0xff]   ;;  %v3140_v28 = vld [vmem:[#allocation5 + $0x1ac] ss:$40 sps:$4 sm:$0xff]  }
  0xb4   :  { %2261 = vmatprep.subr.bf16.mxu1 %v3053_v29  ;;  %v3143_v29 = vld [vmem:[#allocation5 + $0x6ac] ss:$40 sps:$4 sm:$0xff]  }
  0xb6   :  { %2219 = vmatpush1.bf16.msra.mxu0 %v3048_v30  ;;  %v3138_v30 = vld [vmem:[#allocation5 + $0x1a8] ss:$40 sps:$4 sm:$0xff]  }
  0xb7   :  { %2262 = vmatpush1.bf16.msra.mxu1 %v3051_v31  ;;  %2220 = vmatprep.subr.bf16.mxu0 %v3056_v32  ;;  %v3141_v31 = vld [vmem:[#allocation5 + $0x6a8] ss:$40 sps:$4 sm:$0xff]   ;;  %v3146_v32 = vld [vmem:[#allocation5 + $0x15c] ss:$40 sps:$4 sm:$0xff]  }
  0xb8   :  { %2263 = vmatprep.subr.bf16.mxu1 %v3059_v33  ;;  %v3149_v33 = vld [vmem:[#allocation5 + $0x65c] ss:$40 sps:$4 sm:$0xff]  }
  0xba   :  { %2221 = vmatpush1.bf16.msra.mxu0 %v3054_v34  ;;  %v3144_v34 = vld [vmem:[#allocation5 + $0x158] ss:$40 sps:$4 sm:$0xff]  }
  0xbb   :  { %2264 = vmatpush1.bf16.msra.mxu1 %v3057_v35  ;;  %2222 = vmatprep.subr.bf16.mxu0 %v3062_v36  ;;  %v3147_v35 = vld [vmem:[#allocation5 + $0x658] ss:$40 sps:$4 sm:$0xff]   ;;  %v3152_v36 = vld [vmem:[#allocation5 + $0x10c] ss:$40 sps:$4 sm:$0xff]  }
  0xbc   :  { %2265 = vmatprep.subr.bf16.mxu1 %v3065_v37  ;;  %v3155_v37 = vld [vmem:[#allocation5 + $0x60c] ss:$40 sps:$4 sm:$0xff]  }
  0xbe   :  { %2223 = vmatpush1.bf16.msra.mxu0 %v3060_v38  ;;  %v3150_v38 = vld [vmem:[#allocation5 + $0x108] ss:$40 sps:$4 sm:$0xff]  }
  0xbf   :  { %2266 = vmatpush1.bf16.msra.mxu1 %v3063_v39  ;;  %2224 = vmatprep.subr.bf16.mxu0 %v3068_v40  ;;  %v3153_v39 = vld [vmem:[#allocation5 + $0x608] ss:$40 sps:$4 sm:$0xff]   ;;  %v3158_v40 = vld [vmem:[#allocation5 + $0xbc] ss:$40 sps:$4 sm:$0xff]  }
  0xc0   :  { %2267 = vmatprep.subr.bf16.mxu1 %v3071_v41  ;;  %v3161_v41 = vld [vmem:[#allocation5 + $0x5bc] ss:$40 sps:$4 sm:$0xff]  }
  0xc2   :  { %2225 = vmatpush1.bf16.msra.mxu0 %v3066_v42  ;;  %v3156_v42 = vld [vmem:[#allocation5 + $0xb8] ss:$40 sps:$4 sm:$0xff]  }
  0xc3   :  { %2268 = vmatpush1.bf16.msra.mxu1 %v3069_v43  ;;  %2226 = vmatprep.subr.bf16.mxu0 %v3074_v44  ;;  %v3159_v43 = vld [vmem:[#allocation5 + $0x5b8] ss:$40 sps:$4 sm:$0xff]   ;;  %v3164_v44 = vld [vmem:[#allocation5 + $0x6c] ss:$40 sps:$4 sm:$0xff]  }
  0xc4   :  { %2269 = vmatprep.subr.bf16.mxu1 %v3077_v45  ;;  %v3167_v45 = vld [vmem:[#allocation5 + $0x56c] ss:$40 sps:$4 sm:$0xff]  }
  0xc6   :  { %2227 = vmatpush1.bf16.msra.mxu0 %v3072_v46  ;;  %v3162_v46 = vld [vmem:[#allocation5 + $0x68] ss:$40 sps:$4 sm:$0xff]  }
  0xc7   :  { %2270 = vmatpush1.bf16.msra.mxu1 %v3075_v47  ;;  %2228 = vmatprep.subr.bf16.mxu0 %v3080_v48  ;;  %v3165_v47 = vld [vmem:[#allocation5 + $0x568] ss:$40 sps:$4 sm:$0xff]   ;;  %v3170_v48 = vld [vmem:[#allocation5 + $0x1c] ss:$40 sps:$4 sm:$0xff]  }
  0xc8   :  { %2271 = vmatprep.subr.bf16.mxu1 %v3083_v49  ;;  %v3173_v49 = vld [vmem:[#allocation5 + $0x51c] ss:$40 sps:$4 sm:$0xff]  }
  0xca   :  { %2229 = vmatpush2.bf16.msra.mxu0 %v3078_v50  ;;  %v3168_v50 = vld [vmem:[#allocation5 + $0x18] ss:$40 sps:$4 sm:$0xff]  }
  0xcb   :  { %2272 = vmatpush2.bf16.msra.mxu1 %v3081_v51  ;;  %2230 = vmatprep.subr.bf16.mxu0 %v3086_v52  ;;  %v3171_v51 = vld [vmem:[#allocation5 + $0x518] ss:$40 sps:$4 sm:$0xff]   ;;  %v3176_v52 = vld [vmem:[#allocation5 + $0x4cc] ss:$40 sps:$4 sm:$0xff]  }
  0xcc   :  { %2273 = vmatprep.subr.bf16.mxu1 %v3089_v55  ;;  %v3179_v55 = vld [vmem:[#allocation5 + $0x9cc] ss:$40 sps:$4 sm:$0xff]  }
  0xce   :  { %2231 = vmatpush2.bf16.msra.mxu0 %v3084_v56  ;;  %v3174_v56 = vld [vmem:[#allocation5 + $0x4c8] ss:$40 sps:$4 sm:$0xff]  }
  0xcf   :  { %2274 = vmatpush2.bf16.msra.mxu1 %v3087_v57  ;;  %2232 = vmatprep.subr.bf16.mxu0 %v3092_v58  ;;  %v3177_v57 = vld [vmem:[#allocation5 + $0x9c8] ss:$40 sps:$4 sm:$0xff]   ;;  %v3182_v58 = vld [vmem:[#allocation5 + $0x47c] ss:$40 sps:$4 sm:$0xff]  }
  0xd0   :  { %2275 = vmatprep.subr.bf16.mxu1 %v3095_v59  ;;  %v3185_v59 = vld [vmem:[#allocation5 + $0x97c] ss:$40 sps:$4 sm:$0xff]  }
  0xd2   :  { %2233 = vmatpush2.bf16.msra.mxu0 %v3090_v60  ;;  %v3180_v60 = vld [vmem:[#allocation5 + $0x478] ss:$40 sps:$4 sm:$0xff]  }
  0xd3   :  { %2276 = vmatpush2.bf16.msra.mxu1 %v3093_v61  ;;  %2234 = vmatprep.subr.bf16.mxu0 %v3098_v62  ;;  %v3183_v61 = vld [vmem:[#allocation5 + $0x978] ss:$40 sps:$4 sm:$0xff]   ;;  %v3188_v62 = vld [vmem:[#allocation5 + $0x42c] ss:$40 sps:$4 sm:$0xff]  }
  0xd4   :  { %2277 = vmatprep.subr.bf16.mxu1 %v3101_v63  ;;  %v3191_v63 = vld [vmem:[#allocation5 + $0x92c] ss:$40 sps:$4 sm:$0xff]  }
  0xd6   :  { %2235 = vmatpush2.bf16.msra.mxu0 %v3096_v0  ;;  %v3186_v0 = vld [vmem:[#allocation5 + $0x428] ss:$40 sps:$4 sm:$0xff]  }
  0xd7   :  { %2278 = vmatpush2.bf16.msra.mxu1 %v3099_v1  ;;  %2236 = vmatprep.subr.bf16.mxu0 %v3104_v2  ;;  %v3189_v1 = vld [vmem:[#allocation5 + $0x928] ss:$40 sps:$4 sm:$0xff]   ;;  %v3194_v2 = vld [vmem:[#allocation5 + $0x3dc] ss:$40 sps:$4 sm:$0xff]  }
  0xd8   :  { %2279 = vmatprep.subr.bf16.mxu1 %v3107_v3  ;;  %v3197_v3 = vld [vmem:[#allocation5 + $0x8dc] ss:$40 sps:$4 sm:$0xff]  }
  0xda   :  { %2237 = vmatpush2.bf16.msra.mxu0 %v3102_v4  ;;  %v3192_v4 = vld [vmem:[#allocation5 + $0x3d8] ss:$40 sps:$4 sm:$0xff]  }
  0xdb   :  { %2280 = vmatpush2.bf16.msra.mxu1 %v3105_v5  ;;  %2238 = vmatprep.subr.bf16.mxu0 %v3110_v6  ;;  %v3195_v5 = vld [vmem:[#allocation5 + $0x8d8] ss:$40 sps:$4 sm:$0xff]   ;;  %v3200_v6 = vld [vmem:[#allocation5 + $0x38c] ss:$40 sps:$4 sm:$0xff]  }
  0xdc   :  { %2281 = vmatprep.subr.bf16.mxu1 %v3113_v7  ;;  %v3203_v7 = vld [vmem:[#allocation5 + $0x88c] ss:$40 sps:$4 sm:$0xff]  }
  0xde   :  { %2239 = vmatpush2.bf16.msra.mxu0 %v3108_v8  ;;  %v3198_v8 = vld [vmem:[#allocation5 + $0x388] ss:$40 sps:$4 sm:$0xff]  }
  0xdf   :  { %2282 = vmatpush2.bf16.msra.mxu1 %v3111_v9  ;;  %2240 = vmatprep.subr.bf16.mxu0 %v3116_v10  ;;  %v3201_v9 = vld [vmem:[#allocation5 + $0x888] ss:$40 sps:$4 sm:$0xff]   ;;  %v3206_v10 = vld [vmem:[#allocation5 + $0x33c] ss:$40 sps:$4 sm:$0xff]  }
  0xe0   :  { %2283 = vmatprep.subr.bf16.mxu1 %v3119_v11  ;;  %v3209_v11 = vld [vmem:[#allocation5 + $0x83c] ss:$40 sps:$4 sm:$0xff]  }
  0xe2   :  { %2241 = vmatpush2.bf16.msra.mxu0 %v3114_v14  ;;  %v3204_v14 = vld [vmem:[#allocation5 + $0x338] ss:$40 sps:$4 sm:$0xff]  }
  0xe3   :  { %2284 = vmatpush2.bf16.msra.mxu1 %v3117_v15  ;;  %2242 = vmatprep.subr.bf16.mxu0 %v3122_v16  ;;  %v3207_v15 = vld [vmem:[#allocation5 + $0x838] ss:$40 sps:$4 sm:$0xff]   ;;  %v390_v16 = vlaneseq }
  0xe4   :  { %2285 = vmatprep.subr.bf16.mxu1 %v3125_v17  ;;  %v3212_v17 = vld [vmem:[#allocation5 + $0x2ec] ss:$40 sps:$4 sm:$0xff]  }
  0xe6   :  { %2243 = vmatpush2.bf16.msra.mxu0 %v3120_v18  ;;  %v3215_v18 = vld [vmem:[#allocation5 + $0x7ec] ss:$40 sps:$4 sm:$0xff]  }
  0xe7   :  { %2286 = vmatpush2.bf16.msra.mxu1 %v3123_v19  ;;  %2298 = vmatprep.subr.bf16.mxu0 %v3128_v20  ;;  %v3210_v19 = vld [vmem:[#allocation5 + $0x2e8] ss:$40 sps:$4 sm:$0xff]  }
  0xe8   :  { %2341 = vmatprep.subr.bf16.mxu1 %v3131_v21  ;;  %v3213_v20 = vld [vmem:[#allocation5 + $0x7e8] ss:$40 sps:$4 sm:$0xff]   ;;  %v3465_v21 = vshrl.u32 %v390_v16, 7 }
  0xe9   :  { %2245 = vmatmul.mubr.bf16.vlgmr.msra.gmra.mxu0 %v3449_v12  ;;  %v3267_v16 = vld [vmem:[#allocation5 + $0x520] ss:$40 sps:$4 sm:$0xff]  }
  0xea   :  { %2288 = vmatmul.mubr.bf16.vlgmr.msra.gmra.mxu1 %v3451_v13  ;;  %2299 = vmatpush1.bf16.msra.mxu0 %v3126_v22  ;;  %v3218_v22 = vld [vmem:[#allocation5 + $0x29c] ss:$40 sps:$4 sm:$0xff]  }
  0xeb   :  { %2342 = vmatpush1.bf16.msra.mxu1 %v3129_v23  ;;  %2300 = vmatprep.subr.bf16.mxu0 %v3134_v24  ;;  %v3221_v23 = vld [vmem:[#allocation5 + $0x79c] ss:$40 sps:$4 sm:$0xff]   ;;  %v3216_v24 = vld [vmem:[#allocation5 + $0x298] ss:$40 sps:$4 sm:$0xff]  }
  0xec   :  { %2343 = vmatprep.subr.bf16.mxu1 %v3137_v25  ;;  %2330 = vmatprep.mubr.bf16.mxu0 %v3443_v53  ;;  %v3219_v25 = vld [vmem:[#allocation5 + $0x798] ss:$40 sps:$4 sm:$0xff]  }
  0xed   :  { %2373 = vmatprep.mubr.bf16.mxu1 %v3445_v54 }
  0xee   :  { %2301 = vmatpush1.bf16.msra.mxu0 %v3132_v26  ;;  %v392_v26 = vsub.s32 0, %v3465_v21 }
  0xef   :  { %2344 = vmatpush1.bf16.msra.mxu1 %v3135_v27  ;;  %2302 = vmatprep.subr.bf16.mxu0 %v3140_v28  ;;  %v3468_v27 = vld [vmem:[#allocation7] sm:$0xff]  ;;  %v3224_v28 = vld [vmem:[#allocation5 + $0x254] ss:$40 sps:$4 sm:$0xff]  }
  0xf0   :  { %2345 = vmatprep.subr.bf16.mxu1 %v3143_v29  ;;  %v3227_v29 = vld [vmem:[#allocation5 + $0x754] ss:$40 sps:$4 sm:$0xff]  }
  0xf2   :  { %2303 = vmatpush1.bf16.msra.mxu0 %v3138_v30  ;;  %v396_v30 = vsub.s32 1, %v3465_v21 }
  0xf3   :  { %2346 = vmatpush1.bf16.msra.mxu1 %v3141_v31  ;;  %2304 = vmatprep.subr.bf16.mxu0 %v3146_v32  ;;  %v393_v31 = vrot.slane %v3468_v27, %v392_v26  ;;  %v3222_v32 = vld [vmem:[#allocation5 + $0x250] ss:$40 sps:$4 sm:$0xff]  }
  0xf4   :  { %2347 = vmatprep.subr.bf16.mxu1 %v3149_v33  ;;  %v3225_v33 = vld [vmem:[#allocation5 + $0x750] ss:$40 sps:$4 sm:$0xff]  }
  0xf6   :  { %2305 = vmatpush1.bf16.msra.mxu0 %v3144_v34  ;;  %v3230_v34 = vld [vmem:[#allocation5 + $0x204] ss:$40 sps:$4 sm:$0xff]  }
  0xf7   :  { %2348 = vmatpush1.bf16.msra.mxu1 %v3147_v35  ;;  %2306 = vmatprep.subr.bf16.mxu0 %v3152_v36  ;;  %v3233_v35 = vld [vmem:[#allocation5 + $0x704] ss:$40 sps:$4 sm:$0xff]   ;;  %v397_v36 = vrot.slane %v3468_v27, %v396_v30 }
  0xf8   :  { %2349 = vmatprep.subr.bf16.mxu1 %v3155_v37 }
  0xfa   :  { %2307 = vmatpush1.bf16.msra.mxu0 %v3150_v38 }
  0xfb   :  { %2350 = vmatpush1.bf16.msra.mxu1 %v3153_v39  ;;  %2308 = vmatprep.subr.bf16.mxu0 %v3158_v40  ;;  %v3228_v40 = vld [vmem:[#allocation5 + $0x200] ss:$40 sps:$4 sm:$0xff]  }
  0xfc   :  { %2351 = vmatprep.subr.bf16.mxu1 %v3161_v41  ;;  %v3231_v41 = vld [vmem:[#allocation5 + $0x700] ss:$40 sps:$4 sm:$0xff]  }
  0xfe   :  { %2309 = vmatpush1.bf16.msra.mxu0 %v3156_v42 }
  0xff   :  { %2352 = vmatpush1.bf16.msra.mxu1 %v3159_v43  ;;  %2310 = vmatprep.subr.bf16.mxu0 %v3164_v44  ;;  %v3236_v44 = vld [vmem:[#allocation5 + $0x1b4] ss:$40 sps:$4 sm:$0xff]  }
 0x100   :  { %2353 = vmatprep.subr.bf16.mxu1 %v3167_v45  ;;  %v3239_v45 = vld [vmem:[#allocation5 + $0x6b4] ss:$40 sps:$4 sm:$0xff]  }
 0x102   :  { %2311 = vmatpush1.bf16.msra.mxu0 %v3162_v46 }
 0x103   :  { %2354 = vmatpush1.bf16.msra.mxu1 %v3165_v47  ;;  %2312 = vmatprep.subr.bf16.mxu0 %v3170_v48 }
 0x104   :  { %2355 = vmatprep.subr.bf16.mxu1 %v3173_v49 }
 0x106   :  { %2313 = vmatpush1.bf16.msra.mxu0 %v3168_v50 }
 0x107   :  { %2356 = vmatpush1.bf16.msra.mxu1 %v3171_v51  ;;  %2314 = vmatprep.subr.bf16.mxu0 %v3176_v52  ;;  %v3234_v52 = vld [vmem:[#allocation5 + $0x1b0] ss:$40 sps:$4 sm:$0xff]  }
 0x108   :  { %2357 = vmatprep.subr.bf16.mxu1 %v3179_v55  ;;  %v3237_v55 = vld [vmem:[#allocation5 + $0x6b0] ss:$40 sps:$4 sm:$0xff]  }
 0x10a   :  { %2315 = vmatpush2.bf16.msra.mxu0 %v3174_v56 }
 0x10b   :  { %2358 = vmatpush2.bf16.msra.mxu1 %v3177_v57  ;;  %2316 = vmatprep.subr.bf16.mxu0 %v3182_v58  ;;  %v3242_v57 = vld [vmem:[#allocation5 + $0x164] ss:$40 sps:$4 sm:$0xff]  }
 0x10c   :  { %2359 = vmatprep.subr.bf16.mxu1 %v3185_v59  ;;  %v3245_v58 = vld [vmem:[#allocation5 + $0x664] ss:$40 sps:$4 sm:$0xff]  }
 0x10e   :  { %2317 = vmatpush2.bf16.msra.mxu0 %v3180_v60 }
 0x10f   :  { %2360 = vmatpush2.bf16.msra.mxu1 %v3183_v61  ;;  %2318 = vmatprep.subr.bf16.mxu0 %v3188_v62  ;;  %v3240_v61 = vld [vmem:[#allocation5 + $0x160] ss:$40 sps:$4 sm:$0xff]  }
 0x110   :  { %2361 = vmatprep.subr.bf16.mxu1 %v3191_v63  ;;  %v3243_v62 = vld [vmem:[#allocation5 + $0x660] ss:$40 sps:$4 sm:$0xff]   ;;  %v3248_v63 = vld [vmem:[#allocation5 + $0x114] ss:$40 sps:$4 sm:$0xff]  }
 0x112   :  { %2319 = vmatpush2.bf16.msra.mxu0 %v3186_v0  ;;  %v3251_v0 = vld [vmem:[#allocation5 + $0x614] ss:$40 sps:$4 sm:$0xff]  }
 0x113   :  { %2362 = vmatpush2.bf16.msra.mxu1 %v3189_v1  ;;  %2320 = vmatprep.subr.bf16.mxu0 %v3194_v2  ;;  %v3246_v1 = vld [vmem:[#allocation5 + $0x110] ss:$40 sps:$4 sm:$0xff]  }
 0x114   :  { %2363 = vmatprep.subr.bf16.mxu1 %v3197_v3  ;;  %v3249_v2 = vld [vmem:[#allocation5 + $0x610] ss:$40 sps:$4 sm:$0xff]   ;;  %v3254_v3 = vld [vmem:[#allocation5 + $0xc4] ss:$40 sps:$4 sm:$0xff]  }
 0x116   :  { %2321 = vmatpush2.bf16.msra.mxu0 %v3192_v4  ;;  %v3257_v4 = vld [vmem:[#allocation5 + $0x5c4] ss:$40 sps:$4 sm:$0xff]  }
 0x117   :  { %2364 = vmatpush2.bf16.msra.mxu1 %v3195_v5  ;;  %2322 = vmatprep.subr.bf16.mxu0 %v3200_v6  ;;  %v3252_v5 = vld [vmem:[#allocation5 + $0xc0] ss:$40 sps:$4 sm:$0xff]  }
 0x118   :  { %2365 = vmatprep.subr.bf16.mxu1 %v3203_v7  ;;  %v3255_v6 = vld [vmem:[#allocation5 + $0x5c0] ss:$40 sps:$4 sm:$0xff]   ;;  %v3260_v7 = vld [vmem:[#allocation5 + $0x74] ss:$40 sps:$4 sm:$0xff]  }
 0x11a   :  { %2323 = vmatpush2.bf16.msra.mxu0 %v3198_v8  ;;  %v3263_v8 = vld [vmem:[#allocation5 + $0x574] ss:$40 sps:$4 sm:$0xff]  }
 0x11b   :  { %2366 = vmatpush2.bf16.msra.mxu1 %v3201_v9  ;;  %2324 = vmatprep.subr.bf16.mxu0 %v3206_v10  ;;  %v3258_v9 = vld [vmem:[#allocation5 + $0x70] ss:$40 sps:$4 sm:$0xff]  }
 0x11c   :  { %2367 = vmatprep.subr.bf16.mxu1 %v3209_v11  ;;  %v3261_v10 = vld [vmem:[#allocation5 + $0x570] ss:$40 sps:$4 sm:$0xff]   ;;  %v3266_v11 = vld [vmem:[#allocation5 + $0x24] ss:$40 sps:$4 sm:$0xff]  }
 0x11e   :  { %2325 = vmatpush2.bf16.msra.mxu0 %v3204_v14  ;;  %v3269_v14 = vld [vmem:[#allocation5 + $0x524] ss:$40 sps:$4 sm:$0xff]  }
 0x11f   :  { %2368 = vmatpush2.bf16.msra.mxu1 %v3207_v15  ;;  %2326 = vmatprep.subr.bf16.mxu0 %v3212_v17  ;;  %v3264_v15 = vld [vmem:[#allocation5 + $0x20] ss:$40 sps:$4 sm:$0xff]   ;;  %v3272_v17 = vld [vmem:[#allocation5 + $0x4d4] ss:$40 sps:$4 sm:$0xff]  }
 0x120   :  { %2369 = vmatprep.subr.bf16.mxu1 %v3215_v18  ;;  %v3275_v18 = vld [vmem:[#allocation5 + $0x9d4] ss:$40 sps:$4 sm:$0xff]  }
 0x122   :  { %2327 = vmatpush2.bf16.msra.mxu0 %v3210_v19  ;;  %v3270_v19 = vld [vmem:[#allocation5 + $0x4d0] ss:$40 sps:$4 sm:$0xff]  }
 0x123   :  { %2370 = vmatpush2.bf16.msra.mxu1 %v3213_v20  ;;  %2328 = vmatprep.subr.bf16.mxu0 %v3218_v22  ;;  %v3273_v20 = vld [vmem:[#allocation5 + $0x9d0] ss:$40 sps:$4 sm:$0xff]   ;;  %v3278_v22 = vld [vmem:[#allocation5 + $0x484] ss:$40 sps:$4 sm:$0xff]  }
 0x124   :  { %2371 = vmatprep.subr.bf16.mxu1 %v3221_v23  ;;  %v3281_v23 = vld [vmem:[#allocation5 + $0x984] ss:$40 sps:$4 sm:$0xff]  }
 0x126   :  { %2329 = vmatpush2.bf16.msra.mxu0 %v3216_v24  ;;  %v3276_v24 = vld [vmem:[#allocation5 + $0x480] ss:$40 sps:$4 sm:$0xff]  }
 0x127   :  { %2372 = vmatpush2.bf16.msra.mxu1 %v3219_v25  ;;  %2384 = vmatprep.subr.bf16.mxu0 %v3224_v28  ;;  %v3279_v25 = vld [vmem:[#allocation5 + $0x980] ss:$40 sps:$4 sm:$0xff]   ;;  %v3284_v28 = vld [vmem:[#allocation5 + $0x434] ss:$40 sps:$4 sm:$0xff]  }
 0x128   :  { %2427 = vmatprep.subr.bf16.mxu1 %v3227_v29  ;;  %v3287_v29 = vld [vmem:[#allocation5 + $0x934] ss:$40 sps:$4 sm:$0xff]  }
 0x129   :  { %v2074_v37 = vpop.f32.mrf.mxu0  ;;  %2331 = vmatmul.mubr.bf16.vlgmr.msra.gmra.mxu0 %v3449_v12 }
 0x12a   :  { %v2117_v38 = vpop.f32.mrf.mxu1  ;;  %2374 = vmatmul.mubr.bf16.vlgmr.msra.gmra.mxu1 %v3451_v13  ;;  %v2075_v39 = vadd.f32 %v2074_v37, %v393_v31  ;;  %2385 = vmatpush1.bf16.msra.mxu0 %v3222_v32  ;;  %v3285_v32 = vld [vmem:[#allocation5 + $0x930] ss:$40 sps:$4 sm:$0xff]   ;;  %v3296_v37 = vld [vmem:[#allocation5 + $0x394] ss:$40 sps:$4 sm:$0xff]  }
 0x12b   :  { %2428 = vmatpush1.bf16.msra.mxu1 %v3225_v33  ;;  %v2076_v42 = vpop.f32.mrf.mxu0  ;;  %2386 = vmatprep.subr.bf16.mxu0 %v3230_v34  ;;  %v3290_v33 = vld [vmem:[#allocation5 + $0x3e4] ss:$40 sps:$4 sm:$0xff]  }
 0x12c   :  { %v2119_v43 = vpop.f32.mrf.mxu1  ;;  %2429 = vmatprep.subr.bf16.mxu1 %v3233_v35  ;;  %v2118_v46 = vadd.f32 %v2117_v38, %v2075_v39  ;;  %v2077_v47 = vadd.f32 %v2076_v42, %v397_v36  ;;  %2416 = vmatprep.mubr.bf16.mxu0 %v3443_v53  ;;  %v3293_v34 = vld [vmem:[#allocation5 + $0x8e4] ss:$40 sps:$4 sm:$0xff]   ;;  %v3288_v35 = vld [vmem:[#allocation5 + $0x3e0] ss:$40 sps:$4 sm:$0xff]   ;;  %v3299_v38 = vld [vmem:[#allocation5 + $0x894] ss:$40 sps:$4 sm:$0xff]  }
 0x12d   :  { %2459 = vmatprep.mubr.bf16.mxu1 %v3445_v54  ;;  %v2078_v48 = vpop.f32.mrf.mxu0  ;;  %v3294_v39 = vld [vmem:[#allocation5 + $0x390] ss:$40 sps:$4 sm:$0xff]   ;;  %v3305_v42 = vld [vmem:[#allocation5 + $0x844] ss:$40 sps:$4 sm:$0xff]  }
 0x12e   :  { %v2121_v49 = vpop.f32.mrf.mxu1  ;;  %2470 = vst [vmem:[#allocation8] sm:$0xff] %v2118_v46  ;;  %v2120_v50 = vadd.f32 %v2119_v43, %v2077_v47  ;;  %v2079_v51 = vadd.f32 %v2078_v48, %v393_v31  ;;  %2387 = vmatpush1.bf16.msra.mxu0 %v3228_v40  ;;  %v3282_v31 = vld [vmem:[#allocation5 + $0x430] ss:$40 sps:$4 sm:$0xff]   ;;  %v3300_v43 = vld [vmem:[#allocation5 + $0x340] ss:$40 sps:$4 sm:$0xff]  }
 0x12f   :  { %2430 = vmatpush1.bf16.msra.mxu1 %v3231_v41  ;;  %v2080_v56 = vpop.f32.mrf.mxu0  ;;  %2388 = vmatprep.subr.bf16.mxu0 %v3236_v44  ;;  %v3297_v40 = vld [vmem:[#allocation5 + $0x890] ss:$40 sps:$4 sm:$0xff]   ;;  %v3302_v41 = vld [vmem:[#allocation5 + $0x344] ss:$40 sps:$4 sm:$0xff]   ;;  %v3303_v44 = vld [vmem:[#allocation5 + $0x840] ss:$40 sps:$4 sm:$0xff]  }
 0x130   :  { %2431 = vmatprep.subr.bf16.mxu1 %v3239_v45  ;;  %2471 = vst [vmem:[#allocation8 + $0x8] sm:$0xff] %v2120_v50  ;;  %v2122_v59 = vadd.f32 %v2121_v49, %v2079_v51  ;;  %v2081_v60 = vadd.f32 %v2080_v56, %v397_v36  ;;  %v2123_v53 = vpop.f32.mrf.mxu1  ;;  %v3291_v36 = vld [vmem:[#allocation5 + $0x8e0] ss:$40 sps:$4 sm:$0xff]   ;;  %v3308_v45 = vld [vmem:[#allocation5 + $0x2f4] ss:$40 sps:$4 sm:$0xff]   ;;  %v404_v56 = vsub.s32 3, %v3465_v21 }
 0x131   :  { %v3311_v46 = vld [vmem:[#allocation5 + $0x7f4] ss:$40 sps:$4 sm:$0xff]   ;;  %v3306_v47 = vld [vmem:[#allocation5 + $0x2f0] ss:$40 sps:$4 sm:$0xff]   ;;  %v3314_v49 = vld [vmem:[#allocation5 + $0x2a4] ss:$40 sps:$4 sm:$0xff]  }
 0x132   :  { %2480 = vst [vmem:[#allocation8 + $0x50] sm:$0xff] %v2122_v59  ;;  %v2124_v54 = vadd.f32 %v2123_v53, %v2081_v60  ;;  %2389 = vmatpush1.bf16.msra.mxu0 %v3234_v52  ;;  %v3309_v48 = vld [vmem:[#allocation5 + $0x7f0] ss:$40 sps:$4 sm:$0xff]   ;;  %v3317_v50 = vld [vmem:[#allocation5 + $0x7a4] ss:$40 sps:$4 sm:$0xff]  }
 0x133   :  { %2432 = vmatpush1.bf16.msra.mxu1 %v3237_v55  ;;  %2390 = vmatprep.subr.bf16.mxu0 %v3242_v57  ;;  %v3312_v51 = vld [vmem:[#allocation5 + $0x2a0] ss:$40 sps:$4 sm:$0xff]   ;;  %v400_v55 = vsub.s32 2, %v3465_v21 }
 0x134   :  { %2433 = vmatprep.subr.bf16.mxu1 %v3245_v58  ;;  %2481 = vst [vmem:[#allocation8 + $0x58] sm:$0xff] %v2124_v54  ;;  %v3315_v52 = vld [vmem:[#allocation5 + $0x7a0] ss:$40 sps:$4 sm:$0xff]   ;;  %v405_v58 = vrot.slane %v3468_v27, %v404_v56 }
 0x135   :  { %v401_v57 = vrot.slane %v3468_v27, %v400_v55 }
 0x136   :  { %2391 = vmatpush1.bf16.msra.mxu0 %v3240_v61 }
 0x137   :  { %2434 = vmatpush1.bf16.msra.mxu1 %v3243_v62  ;;  %2392 = vmatprep.subr.bf16.mxu0 %v3248_v63 }
 0x138   :  { %2435 = vmatprep.subr.bf16.mxu1 %v3251_v0 }
 0x13a   :  { %2393 = vmatpush1.bf16.msra.mxu0 %v3246_v1 }
 0x13b   :  { %2436 = vmatpush1.bf16.msra.mxu1 %v3249_v2  ;;  %2394 = vmatprep.subr.bf16.mxu0 %v3254_v3 }
 0x13c   :  { %2437 = vmatprep.subr.bf16.mxu1 %v3257_v4 }
 0x13e   :  { %2395 = vmatpush1.bf16.msra.mxu0 %v3252_v5 }
 0x13f   :  { %2438 = vmatpush1.bf16.msra.mxu1 %v3255_v6  ;;  %2396 = vmatprep.subr.bf16.mxu0 %v3260_v7 }
 0x140   :  { %2439 = vmatprep.subr.bf16.mxu1 %v3263_v8 }
 0x142   :  { %2397 = vmatpush1.bf16.msra.mxu0 %v3258_v9 }
 0x143   :  { %2440 = vmatpush1.bf16.msra.mxu1 %v3261_v10  ;;  %2398 = vmatprep.subr.bf16.mxu0 %v3266_v11 }
 0x144   :  { %2441 = vmatprep.subr.bf16.mxu1 %v3269_v14 }
 0x146   :  { %2399 = vmatpush1.bf16.msra.mxu0 %v3264_v15 }
 0x147   :  { %2442 = vmatpush1.bf16.msra.mxu1 %v3267_v16  ;;  %2400 = vmatprep.subr.bf16.mxu0 %v3272_v17 }
 0x148   :  { %2443 = vmatprep.subr.bf16.mxu1 %v3275_v18 }
 0x14a   :  { %2401 = vmatpush2.bf16.msra.mxu0 %v3270_v19 }
 0x14b   :  { %2444 = vmatpush2.bf16.msra.mxu1 %v3273_v20  ;;  %2402 = vmatprep.subr.bf16.mxu0 %v3278_v22 }
 0x14c   :  { %2445 = vmatprep.subr.bf16.mxu1 %v3281_v23 }
 0x14e   :  { %2403 = vmatpush2.bf16.msra.mxu0 %v3276_v24 }
 0x14f   :  { %2446 = vmatpush2.bf16.msra.mxu1 %v3279_v25  ;;  %2404 = vmatprep.subr.bf16.mxu0 %v3284_v28 }
 0x150   :  { %2447 = vmatprep.subr.bf16.mxu1 %v3287_v29 }
 0x152   :  { %2405 = vmatpush2.bf16.msra.mxu0 %v3282_v31 }
 0x153   :  { %2448 = vmatpush2.bf16.msra.mxu1 %v3285_v32  ;;  %2406 = vmatprep.subr.bf16.mxu0 %v3290_v33  ;;  %v416_v33 = vsub.s32 6, %v3465_v21 }
 0x154   :  { %2449 = vmatprep.subr.bf16.mxu1 %v3293_v34  ;;  %v420_v34 = vsub.s32 7, %v3465_v21 }
 0x156   :  { %2407 = vmatpush2.bf16.msra.mxu0 %v3288_v35  ;;  %v417_v35 = vrot.slane %v3468_v27, %v416_v33 }
 0x157   :  { %2450 = vmatpush2.bf16.msra.mxu1 %v3291_v36  ;;  %2408 = vmatprep.subr.bf16.mxu0 %v3296_v37  ;;  %v421_v36 = vrot.slane %v3468_v27, %v420_v34 }
 0x158   :  { %2451 = vmatprep.subr.bf16.mxu1 %v3299_v38 }
 0x15a   :  { %2409 = vmatpush2.bf16.msra.mxu0 %v3294_v39 }
 0x15b   :  { %2452 = vmatpush2.bf16.msra.mxu1 %v3297_v40  ;;  %2410 = vmatprep.subr.bf16.mxu0 %v3302_v41 }
 0x15c   :  { %2453 = vmatprep.subr.bf16.mxu1 %v3305_v42 }
 0x15e   :  { %2411 = vmatpush2.bf16.msra.mxu0 %v3300_v43 }
 0x15f   :  { %2454 = vmatpush2.bf16.msra.mxu1 %v3303_v44  ;;  %2412 = vmatprep.subr.bf16.mxu0 %v3308_v45 }
 0x160   :  { %2455 = vmatprep.subr.bf16.mxu1 %v3311_v46 }
 0x162   :  { %2413 = vmatpush2.bf16.msra.mxu0 %v3306_v47 }
 0x163   :  { %2456 = vmatpush2.bf16.msra.mxu1 %v3309_v48  ;;  %2414 = vmatprep.subr.bf16.mxu0 %v3314_v49 }
 0x164   :  { %2457 = vmatprep.subr.bf16.mxu1 %v3317_v50 }
 0x166   :  { %2415 = vmatpush2.bf16.msra.mxu0 %v3312_v51 }
 0x167   :  { %2458 = vmatpush2.bf16.msra.mxu1 %v3315_v52 }
 0x169   :  { %v2160_v59 = vpop.f32.mrf.mxu0  ;;  %2417 = vmatmul.mubr.bf16.vlgmr.msra.gmra.mxu0 %v3449_v12  ;;  %v408_v12 = vsub.s32 4, %v3465_v21 }
 0x16a   :  { %v2203_v60 = vpop.f32.mrf.mxu1  ;;  %2460 = vmatmul.mubr.bf16.vlgmr.msra.gmra.mxu1 %v3451_v13  ;;  %v2161_v53 = vadd.f32 %v2160_v59, %v401_v57  ;;  %v412_v13 = vsub.s32 5, %v3465_v21 }
 0x16b   :  { %v2162_v54 = vpop.f32.mrf.mxu0  ;;  %v409_v9 = vrot.slane %v3468_v27, %v408_v12 }
 0x16c   :  { %v2205_v61 = vpop.f32.mrf.mxu1  ;;  %v2204_v62 = vadd.f32 %v2203_v60, %v2161_v53  ;;  %v2163_v63 = vadd.f32 %v2162_v54, %v405_v58  ;;  %v413_v10 = vrot.slane %v3468_v27, %v412_v13  ;;  %v387_v27 = vld [vmem:[#allocation7 + $0x8] sm:$0x3] }
 0x16d   :  { %v2164_v0 = vpop.f32.mrf.mxu0  ;;  %v425_v55 = vrot.slane %v387_v27, %v392_v26  ;;  %v429_v56 = vrot.slane %v387_v27, %v396_v30 }
 0x16e   :  { %v2207_v1 = vpop.f32.mrf.mxu1  ;;  %2472 = vst [vmem:[#allocation8 + $0x10] sm:$0xff] %v2204_v62  ;;  %v2206_v2 = vadd.f32 %v2205_v61, %v2163_v63  ;;  %v2165_v3 = vadd.f32 %v2164_v0, %v401_v57 }
 0x16f   :  { %v2166_v4 = vpop.f32.mrf.mxu0 }
 0x170   :  { %2473 = vst [vmem:[#allocation8 + $0x18] sm:$0xff] %v2206_v2  ;;  %v2208_v5 = vadd.f32 %v2207_v1, %v2165_v3  ;;  %v2167_v6 = vadd.f32 %v2166_v4, %v405_v58  ;;  %v2209_v7 = vpop.f32.mrf.mxu1 }
 0x172   :  { %2482 = vst [vmem:[#allocation8 + $0x60] sm:$0xff] %v2208_v5  ;;  %v2210_v8 = vadd.f32 %v2209_v7, %v2167_v6 }
 0x174   :  { %2483 = vst [vmem:[#allocation8 + $0x68] sm:$0xff] %v2210_v8 }
 0x1a9   :  { %v2246_v11 = vpop.f32.mrf.mxu0 }
 0x1aa   :  { %v2289_v14 = vpop.f32.mrf.mxu1  ;;  %v2247_v15 = vadd.f32 %v2246_v11, %v409_v9 }
 0x1ab   :  { %v2248_v16 = vpop.f32.mrf.mxu0 }
 0x1ac   :  { %v2291_v17 = vpop.f32.mrf.mxu1  ;;  %v2290_v18 = vadd.f32 %v2289_v14, %v2247_v15  ;;  %v2249_v19 = vadd.f32 %v2248_v16, %v413_v10 }
 0x1ad   :  { %v2250_v20 = vpop.f32.mrf.mxu0 }
 0x1ae   :  { %v2293_v22 = vpop.f32.mrf.mxu1  ;;  %2474 = vst [vmem:[#allocation8 + $0x20] sm:$0xff] %v2290_v18  ;;  %v2292_v23 = vadd.f32 %v2291_v17, %v2249_v19  ;;  %v2251_v24 = vadd.f32 %v2250_v20, %v409_v9 }
 0x1af   :  { %v2252_v25 = vpop.f32.mrf.mxu0 }
 0x1b0   :  { %2475 = vst [vmem:[#allocation8 + $0x28] sm:$0xff] %v2292_v23  ;;  %v2294_v28 = vadd.f32 %v2293_v22, %v2251_v24  ;;  %v2253_v29 = vadd.f32 %v2252_v25, %v413_v10  ;;  %v2295_v31 = vpop.f32.mrf.mxu1 }
 0x1b2   :  { %2484 = vst [vmem:[#allocation8 + $0x70] sm:$0xff] %v2294_v28  ;;  %v2296_v32 = vadd.f32 %v2295_v31, %v2253_v29 }
 0x1b4   :  { %2485 = vst [vmem:[#allocation8 + $0x78] sm:$0xff] %v2296_v32 }
 0x1e9   :  { %v2332_v37 = vpop.f32.mrf.mxu0 }
 0x1ea   :  { %v2375_v38 = vpop.f32.mrf.mxu1  ;;  %v2333_v39 = vadd.f32 %v2332_v37, %v417_v35 }
 0x1eb   :  { %v2334_v40 = vpop.f32.mrf.mxu0 }
 0x1ec   :  { %v2377_v41 = vpop.f32.mrf.mxu1  ;;  %v2376_v42 = vadd.f32 %v2375_v38, %v2333_v39  ;;  %v2335_v43 = vadd.f32 %v2334_v40, %v421_v36 }
 0x1ed   :  { %v2336_v44 = vpop.f32.mrf.mxu0 }
 0x1ee   :  { %v2379_v45 = vpop.f32.mrf.mxu1  ;;  %2476 = vst [vmem:[#allocation8 + $0x30] sm:$0xff] %v2376_v42  ;;  %v2378_v46 = vadd.f32 %v2377_v41, %v2335_v43  ;;  %v2337_v47 = vadd.f32 %v2336_v44, %v417_v35 }
 0x1ef   :  { %v2338_v48 = vpop.f32.mrf.mxu0 }
 0x1f0   :  { %2477 = vst [vmem:[#allocation8 + $0x38] sm:$0xff] %v2378_v46  ;;  %v2380_v49 = vadd.f32 %v2379_v45, %v2337_v47  ;;  %v2339_v50 = vadd.f32 %v2338_v48, %v421_v36  ;;  %v2381_v51 = vpop.f32.mrf.mxu1 }
 0x1f2   :  { %2486 = vst [vmem:[#allocation8 + $0x80] sm:$0xff] %v2380_v49  ;;  %v2382_v52 = vadd.f32 %v2381_v51, %v2339_v50 }
 0x1f4   :  { %2487 = vst [vmem:[#allocation8 + $0x88] sm:$0xff] %v2382_v52 }
 0x229   :  { %v2418_v57 = vpop.f32.mrf.mxu0 }
 0x22a   :  { %v2461_v58 = vpop.f32.mrf.mxu1  ;;  %v2419_v59 = vadd.f32 %v2418_v57, %v425_v55 }
 0x22b   :  { %v2420_v60 = vpop.f32.mrf.mxu0 }
 0x22c   :  { %v2463_v53 = vpop.f32.mrf.mxu1  ;;  %v2462_v54 = vadd.f32 %v2461_v58, %v2419_v59  ;;  %v2421_v61 = vadd.f32 %v2420_v60, %v429_v56 }
 0x22d   :  { %v2422_v62 = vpop.f32.mrf.mxu0 }
 0x22e   :  { %v2465_v63 = vpop.f32.mrf.mxu1  ;;  %2478 = vst [vmem:[#allocation8 + $0x40] sm:$0xff] %v2462_v54  ;;  %v2464_v0 = vadd.f32 %v2463_v53, %v2421_v61  ;;  %v2423_v1 = vadd.f32 %v2422_v62, %v425_v55 }
 0x22f   :  { %v2424_v2 = vpop.f32.mrf.mxu0 }
 0x230   :  { %2479 = vst [vmem:[#allocation8 + $0x48] sm:$0xff] %v2464_v0  ;;  %v2466_v26 = vadd.f32 %v2465_v63, %v2423_v1  ;;  %v2425_v3 = vadd.f32 %v2424_v2, %v429_v56  ;;  %v2467_v21 = vpop.f32.mrf.mxu1 }
 0x232   :  { %2488 = vst [vmem:[#allocation8 + $0x90] sm:$0xff] %v2466_v26  ;;  %v2468_v30 = vadd.f32 %v2467_v21, %v2425_v3 }
 0x234   :  { %2489 = vst [vmem:[#allocation8 + $0x98] sm:$0xff] %v2468_v30 }
 0x235   :  { %3389 = shalt.err (!%p3386_p5)
}
 0x236   :  { %s3412_s4 = smov 1280   ;;  %s3413_s5 = smov 80  }
 0x237   :  { %2501 = dma.vmem_to_hbm [thread:$0]  %s2496_s2, 2560, %s3505_s3, [#allocation4], %s3412_s4, %s3412_s4, %s3413_s5  }
 0x238   :  { %3402 = dma.done.wait [#allocation4], 2560  }
 0x239   :  { %3403 = vsyncadd [#allocation4], 4294964736 }
 0x23a   :  { %2505 = vsyncpa [#allocation3], 1 }
 0x23b   :  { %2506 = vsyncpa [#allocation6], 1 }
 0x23c   :  { %2507 = vsyncpa [#allocation4], 1 }

</bundles_post_ra>
